<compile_context>
chip_gen: v6e
topology: v6e:2x2x1
jax: 0.10.0
libtpu: 0.0.40
codegen_flags: <defaults>
</compile_context>

<pallas_src>
from functools import partial

import jax
import jax.numpy as jnp
from jax.experimental import pallas as pl
from jax.experimental.pallas import tpu as pltpu


def _pick_tile_n(n, cap=8192):
    """Largest multiple-of-128 tile dividing N (capped); whole N if small/irregular."""
    if n % 128 != 0 or n <= cap:
        return n
    best = 128
    for t in range(128, cap + 1, 128):
        if n % t == 0:
            best = t
    return best


def _context_kernel(x_ref, wk_ref, wv_ref, wq_ref, wout_ref, mask_ref, a_ref,
                    m_sc, l_sc, ctx_sc, *, hidden):
    """Pass 1: online-softmax accumulation of the per-head context over N-tiles.

    At the last tile the context is block-diagonally head-masked, contracted with
    the to_out weight, and the softmax denominator plus the q-projection weight are
    folded so the output is a per-batch (C, C) mixing matrix A.
    """
    t = pl.program_id(1)

    @pl.when(t == 0)
    def _():
        m_sc[...] = jnp.full_like(m_sc, -jnp.inf)
        l_sc[...] = jnp.zeros_like(l_sc)
        ctx_sc[...] = jnp.zeros_like(ctx_sc)

    x = x_ref[...]                                         # (C, tile_n) f32
    c_in = x.shape[0]

    # k/v projections on the VPU: contraction depth C is tiny, so an unrolled
    # channel loop of (hidden, 1) x (1, tile_n) broadcast madds is cheaper than
    # issuing MXU pushes for a K=C matmul, and it co-issues with the ctx matmul.
    x0 = x[0:1, :]
    k = wk_ref[:, 0:1] * x0                                # (hidden, tile_n)
    v = wv_ref[:, 0:1] * x0                                # (hidden, tile_n)
    for cc in range(1, c_in):
        xc = x[cc:cc + 1, :]
        k = k + wk_ref[:, cc:cc + 1] * xc
        v = v + wv_ref[:, cc:cc + 1] * xc

    # Online softmax over the token (lane) axis, per k channel row.
    m_new = jnp.maximum(m_sc[...], jnp.max(k, axis=1, keepdims=True))
    alpha = jnp.exp(m_sc[...] - m_new)                     # (hidden, 1)
    k_exp = jnp.exp(k - m_new)                             # (hidden, tile_n), in (0, 1]
    # ctx_raw[d, e] += sum_n k_exp[d, n] * v[e, n]; bf16 MXU operands, f32 accumulate.
    ctx_sc[...] = alpha * ctx_sc[...] + jax.lax.dot_general(
        k_exp.astype(jnp.bfloat16), v.astype(jnp.bfloat16),
        (((1,), (1,)), ((), ())), preferred_element_type=jnp.float32)
    l_sc[...] = alpha * l_sc[...] + jnp.sum(k_exp, axis=1, keepdims=True)
    m_sc[...] = m_new

    @pl.when(t == pl.num_programs(1) - 1)
    def _():
        # Per-head semantics via the precomputed block-diagonal mask (one VPU mult).
        ctx = ctx_sc[...] * mask_ref[...]                  # (hidden, hidden)
        # m_mat[o, d] = sum_e Wout[o, e] * ctx_raw[d, e]   (fold to_out weight)
        m_mat = jax.lax.dot_general(
            wout_ref[...], ctx, (((1,), (1,)), ((), ())),
            preferred_element_type=jnp.float32)            # (C, hidden)
        # Softmax denominator folded into Wq rows: hidden*C multiplies, no relayout.
        wq_scaled = wq_ref[...] * (1.0 / l_sc[...])        # (hidden, C)
        # A[o, c] = sum_d m_mat[o, d] * Wq[d, c] / l[d]    (fold q projection)
        a_ref[...] = jnp.dot(m_mat, wq_scaled,
                             preferred_element_type=jnp.float32)  # (C, C)


def _apply_kernel(a_ref, b_ref, x_ref, y_ref):
    """Pass 2: y = blockdiag(A) @ x + b over sublane-dense (B*C, tile_n) slabs."""
    y_ref[...] = (jnp.dot(a_ref[...], x_ref[...],
                          preferred_element_type=jnp.float32)
                  + b_ref[...]).astype(y_ref.dtype)


def global_mixing(x_nchw, w_qkv, w_out, b_out, *, heads, dim_head, tile_n_cap=8192):
    """x_nchw: (B, C, H, W). w_qkv: (3*hidden, C, 1, 1). w_out: (C, hidden, 1, 1)."""
    b, c, h, w = x_nchw.shape
    n = h * w
    hidden = heads * dim_head

    # NCHW -> (B, C, N): free reshape; tokens are lane-dense.
    x_tok = x_nchw.reshape(b, c, n)
    wqkv = w_qkv.reshape(3 * hidden, c)
    wq = wqkv[:hidden, :]                       # (hidden, C)  q projection
    wk = wqkv[hidden:2 * hidden, :]             # (hidden, C)  k projection
    wv = wqkv[2 * hidden:, :]                   # (hidden, C)  v projection
    wout = w_out.reshape(c, hidden)             # (C, hidden)

    # Static block-diagonal head mask, computed once and kept resident in VMEM.
    head_id = jnp.arange(hidden, dtype=jnp.int32) // dim_head
    head_mask = (head_id[:, None] == head_id[None, :]).astype(jnp.float32)

    tile_n = _pick_tile_n(n, tile_n_cap)
    nt = n // tile_n

    # ----------- pass 1: per-batch folded (C, C) mixing matrix A -------------
    flops1 = b * (2 * n * c * 2 * hidden + 2 * n * hidden * hidden
                  + 8 * n * hidden
                  + 2 * c * hidden * hidden + 2 * c * c * hidden
                  + 2 * hidden * hidden + hidden * c)
    bytes1 = 4 * (b * n * c + 4 * hidden * c + hidden * hidden + b * c * c)
    a_mat = pl.pallas_call(
        partial(_context_kernel, hidden=hidden),
        out_shape=jax.ShapeDtypeStruct((b, c, c), jnp.float32),
        grid_spec=pltpu.PrefetchScalarGridSpec(
            num_scalar_prefetch=0,
            grid=(b, nt),
            in_specs=[
                pl.BlockSpec((None, c, tile_n), lambda i, t: (i, 0, t)),  # x tile
                pl.BlockSpec((hidden, c), lambda i, t: (0, 0)),           # W_k
                pl.BlockSpec((hidden, c), lambda i, t: (0, 0)),           # W_v
                pl.BlockSpec((hidden, c), lambda i, t: (0, 0)),           # W_q
                pl.BlockSpec((c, hidden), lambda i, t: (0, 0)),           # W_out
                pl.BlockSpec((hidden, hidden), lambda i, t: (0, 0)),      # head mask
            ],
            out_specs=pl.BlockSpec((None, c, c), lambda i, t: (i, 0, 0)),
            scratch_shapes=[
                pltpu.VMEM((hidden, 1), jnp.float32),        # running max
                pltpu.VMEM((hidden, 1), jnp.float32),        # running denom
                pltpu.VMEM((hidden, hidden), jnp.float32),   # context accumulator
            ],
        ),
        compiler_params=pltpu.CompilerParams(
            dimension_semantics=("parallel", "arbitrary")),
        cost_estimate=pl.CostEstimate(
            flops=int(flops1),
            transcendentals=int(b * (n * hidden + nt * hidden + hidden)),
            bytes_accessed=int(bytes1)),
    )(x_tok, wk, wv, wq, wout, head_mask)

    # ----------- pass 2: y = blockdiag(A) @ x + b, sublane-dense slabs -------
    # Assemble one block-diagonal (B*C, B*C) matrix so every slab fills all 8
    # sublanes and the output store is an unmasked lane-dense vst.
    x_flat = x_nchw.reshape(b * c, n)
    eye_b = jnp.eye(b, dtype=jnp.float32)
    a_big = (eye_b[:, None, :, None] * a_mat[:, :, None, :]).reshape(b * c, b * c)
    bias_big = jnp.tile(b_out.reshape(c, 1).astype(jnp.float32), (b, 1))  # (B*C, 1)

    tile_n2 = _pick_tile_n(n, tile_n_cap)
    nt2 = n // tile_n2
    bc = b * c
    flops2 = 2 * n * bc * bc + n * bc
    bytes2 = 4 * (2 * bc * n + bc * bc + bc)
    y_flat = pl.pallas_call(
        _apply_kernel,
        out_shape=jax.ShapeDtypeStruct((bc, n), jnp.float32),
        grid_spec=pltpu.PrefetchScalarGridSpec(
            num_scalar_prefetch=0,
            grid=(nt2,),
            in_specs=[
                pl.BlockSpec((bc, bc), lambda t: (0, 0)),          # block-diag A
                pl.BlockSpec((bc, 1), lambda t: (0, 0)),           # bias
                pl.BlockSpec((bc, tile_n2), lambda t: (0, t)),     # x slab
            ],
            out_specs=pl.BlockSpec((bc, tile_n2), lambda t: (0, t)),
        ),
        compiler_params=pltpu.CompilerParams(
            dimension_semantics=("parallel",)),
        cost_estimate=pl.CostEstimate(
            flops=int(flops2), transcendentals=0, bytes_accessed=int(bytes2)),
    )(a_big, bias_big, x_flat)

    # (B*C, N) -> NCHW (free reshape)
    return y_flat.reshape(b, c, h, w)


def reference(x, w_qkv, w_out, b_out, heads, dim_head):
    """Pure-JAX mirror of the PyTorch forward, used only for validation."""
    b, dim, h, w = x.shape
    n = h * w
    hidden = heads * dim_head
    qkv = jnp.einsum('bchw,oc->bohw', x, w_qkv.reshape(3 * hidden, dim))
    qkv = qkv.reshape(b, 3, heads, dim_head, n)
    q, k, v = qkv[:, 0], qkv[:, 1], qkv[:, 2]
    k = jax.nn.softmax(k, axis=-1)
    context = jnp.einsum('bhdn,bhen->bhde', k, v)
    out = jnp.einsum('bhde,bhdn->bhen', context, q)
    out = out.reshape(b, hidden, h, w)
    y = jnp.einsum('bchw,oc->bohw', out, w_out.reshape(dim, hidden))
    return y + b_out.reshape(1, dim, 1, 1)


if __name__ == "__main__":
    dim, heads, dim_head = 4, 4, 32
    hidden = heads * dim_head
    b, h, w = 2, 16, 16

    key = jax.random.PRNGKey(0)
    k1, k2, k3, k4 = jax.random.split(key, 4)
    x = jax.random.normal(k1, (b, dim, h, w), jnp.float32)
    # Deterministic synthetic parameters (shapes from nn.Conv2d in __init__).
    w_qkv = 0.1 * jax.random.normal(k2, (3 * hidden, dim, 1, 1), jnp.float32)
    w_out = 0.1 * jax.random.normal(k3, (dim, hidden, 1, 1), jnp.float32)
    b_out = 0.1 * jax.random.normal(k4, (dim,), jnp.float32)

    y_ref = reference(x, w_qkv, w_out, b_out, heads, dim_head)

    # Default (single N tile at this small shape).
    y = global_mixing(x, w_qkv, w_out, b_out, heads=heads, dim_head=dim_head)
    jax.block_until_ready(y)
    assert y.shape == (b, dim, h, w)
    err = float(jnp.max(jnp.abs(y - y_ref)))
    # Tolerance relaxed vs the pure-f32 path because the context matmul feeds the
    # MXU in bf16 (f32 accumulation); observed/expected max error is ~1e-4 level.
    assert jnp.allclose(y, y_ref, atol=2e-3, rtol=2e-3), err

    # Force multiple N tiles to also exercise the online-softmax accumulation path.
    y2 = global_mixing(x, w_qkv, w_out, b_out, heads=heads, dim_head=dim_head,
                       tile_n_cap=128)
    jax.block_until_ready(y2)
    err2 = float(jnp.max(jnp.abs(y2 - y_ref)))
    assert jnp.allclose(y2, y_ref, atol=2e-3, rtol=2e-3), err2

    print("KERNEL_OK")
</pallas_src>

<mosaic_0001>
module attributes {stable_mosaic.version = 11 : i64} {
  func.func @_context_kernel(%arg0: i32, %arg1: i32, %arg2: memref<1x4x256xf32, #tpu.memory_space<vmem>>, %arg3: memref<128x4xf32, #tpu.memory_space<vmem>>, %arg4: memref<128x4xf32, #tpu.memory_space<vmem>>, %arg5: memref<128x4xf32, #tpu.memory_space<vmem>>, %arg6: memref<4x128xf32, #tpu.memory_space<vmem>>, %arg7: memref<128x128xf32, #tpu.memory_space<vmem>>, %arg8: memref<1x4x4xf32, #tpu.memory_space<vmem>>, %arg9: memref<128x1xf32, #tpu.memory_space<vmem>>, %arg10: memref<128x1xf32, #tpu.memory_space<vmem>>, %arg11: memref<128x128xf32, #tpu.memory_space<vmem>>) attributes {dimension_semantics = [#tpu.dimension_semantics<parallel>, #tpu.dimension_semantics<arbitrary>], iteration_bounds = array<i64: 2, 1>, scalar_prefetch = 0 : i64, scratch_operands = 3 : i64, tpu.core_type = #tpu.core_type<tc>, window_params = [{transform_indices = @transform_0, window_bounds = array<i64: 1, 4, 256>}, {pipeline_mode = #tpu.pipeline_mode<synchronous>, transform_indices = @transform_1, window_bounds = array<i64: 128, 4>}, {pipeline_mode = #tpu.pipeline_mode<synchronous>, transform_indices = @transform_2, window_bounds = array<i64: 128, 4>}, {pipeline_mode = #tpu.pipeline_mode<synchronous>, transform_indices = @transform_3, window_bounds = array<i64: 128, 4>}, {pipeline_mode = #tpu.pipeline_mode<synchronous>, transform_indices = @transform_4, window_bounds = array<i64: 4, 128>}, {pipeline_mode = #tpu.pipeline_mode<synchronous>, transform_indices = @transform_5, window_bounds = array<i64: 128, 128>}, {transform_indices = @transform_6, window_bounds = array<i64: 1, 4, 4>}]} {
    %c0_i32 = arith.constant 0 : i32
    %0 = arith.cmpi eq, %arg1, %c0_i32 : i32
    %1 = arith.extui %0 : i1 to i32
    %c0_i32_0 = arith.constant 0 : i32
    %2 = arith.cmpi ne, %1, %c0_i32_0 : i32
    scf.if %2 {
      %cst_34 = arith.constant 0xFF800000 : f32
      %75 = vector.broadcast %cst_34 : f32 to vector<128x1xf32>
      %c0_35 = arith.constant 0 : index
      %c0_36 = arith.constant 0 : index
      %76 = vector.load %arg9[%c0_35, %c0_36] : memref<128x1xf32, #tpu.memory_space<vmem>>, vector<128x1xf32>
      tpu.vector_store %arg9[%c0_35, %c0_36], %75 {strides = array<i32>} : memref<128x1xf32, #tpu.memory_space<vmem>>, vector<128x1xf32>,
      %cst_37 = arith.constant 0.000000e+00 : f32
      %77 = vector.broadcast %cst_37 : f32 to vector<128x1xf32>
      %c0_38 = arith.constant 0 : index
      %c0_39 = arith.constant 0 : index
      %78 = vector.load %arg10[%c0_38, %c0_39] : memref<128x1xf32, #tpu.memory_space<vmem>>, vector<128x1xf32>
      tpu.vector_store %arg10[%c0_38, %c0_39], %77 {strides = array<i32>} : memref<128x1xf32, #tpu.memory_space<vmem>>, vector<128x1xf32>,
      %cst_40 = arith.constant 0.000000e+00 : f32
      %79 = vector.broadcast %cst_40 : f32 to vector<128x128xf32>
      %c0_41 = arith.constant 0 : index
      %c0_42 = arith.constant 0 : index
      %80 = vector.load %arg11[%c0_41, %c0_42] : memref<128x128xf32, #tpu.memory_space<vmem>>, vector<128x128xf32>
      tpu.vector_store %arg11[%c0_41, %c0_42], %79 {strides = array<i32>} : memref<128x128xf32, #tpu.memory_space<vmem>>, vector<128x128xf32>,
    } else {
    }
    %c0 = arith.constant 0 : index
    %c0_1 = arith.constant 0 : index
    %c0_2 = arith.constant 0 : index
    %3 = vector.load %arg2[%c0, %c0_1, %c0_2] : memref<1x4x256xf32, #tpu.memory_space<vmem>>, vector<1x4x256xf32>
    %4 = vector.shape_cast %3 : vector<1x4x256xf32> to vector<4x256xf32>
    %5 = vector.extract_strided_slice %4 {offsets = [0, 0], sizes = [1, 256], strides = [1, 1]} : vector<4x256xf32> to vector<1x256xf32>
    %c0_3 = arith.constant 0 : index
    %c0_4 = arith.constant 0 : index
    %6 = vector.load %arg3[%c0_3, %c0_4] : memref<128x4xf32, #tpu.memory_space<vmem>>, vector<128x1xf32>
    %7 = vector.broadcast %6 : vector<128x1xf32> to vector<128x256xf32>
    %8 = vector.broadcast %5 : vector<1x256xf32> to vector<128x256xf32>
    %9 = arith.mulf %7, %8 : vector<128x256xf32>
    %c0_5 = arith.constant 0 : index
    %c0_6 = arith.constant 0 : index
    %10 = vector.load %arg4[%c0_5, %c0_6] : memref<128x4xf32, #tpu.memory_space<vmem>>, vector<128x1xf32>
    %11 = vector.broadcast %10 : vector<128x1xf32> to vector<128x256xf32>
    %12 = vector.broadcast %5 : vector<1x256xf32> to vector<128x256xf32>
    %13 = arith.mulf %11, %12 : vector<128x256xf32>
    %14 = vector.extract_strided_slice %4 {offsets = [1, 0], sizes = [1, 256], strides = [1, 1]} : vector<4x256xf32> to vector<1x256xf32>
    %c0_7 = arith.constant 0 : index
    %c1 = arith.constant 1 : index
    %15 = vector.load %arg3[%c0_7, %c1] : memref<128x4xf32, #tpu.memory_space<vmem>>, vector<128x1xf32>
    %16 = vector.broadcast %15 : vector<128x1xf32> to vector<128x256xf32>
    %17 = vector.broadcast %14 : vector<1x256xf32> to vector<128x256xf32>
    %18 = arith.mulf %16, %17 : vector<128x256xf32>
    %19 = arith.addf %9, %18 : vector<128x256xf32>
    %c0_8 = arith.constant 0 : index
    %c1_9 = arith.constant 1 : index
    %20 = vector.load %arg4[%c0_8, %c1_9] : memref<128x4xf32, #tpu.memory_space<vmem>>, vector<128x1xf32>
    %21 = vector.broadcast %20 : vector<128x1xf32> to vector<128x256xf32>
    %22 = vector.broadcast %14 : vector<1x256xf32> to vector<128x256xf32>
    %23 = arith.mulf %21, %22 : vector<128x256xf32>
    %24 = arith.addf %13, %23 : vector<128x256xf32>
    %25 = vector.extract_strided_slice %4 {offsets = [2, 0], sizes = [1, 256], strides = [1, 1]} : vector<4x256xf32> to vector<1x256xf32>
    %c0_10 = arith.constant 0 : index
    %c2 = arith.constant 2 : index
    %26 = vector.load %arg3[%c0_10, %c2] : memref<128x4xf32, #tpu.memory_space<vmem>>, vector<128x1xf32>
    %27 = vector.broadcast %26 : vector<128x1xf32> to vector<128x256xf32>
    %28 = vector.broadcast %25 : vector<1x256xf32> to vector<128x256xf32>
    %29 = arith.mulf %27, %28 : vector<128x256xf32>
    %30 = arith.addf %19, %29 : vector<128x256xf32>
    %c0_11 = arith.constant 0 : index
    %c2_12 = arith.constant 2 : index
    %31 = vector.load %arg4[%c0_11, %c2_12] : memref<128x4xf32, #tpu.memory_space<vmem>>, vector<128x1xf32>
    %32 = vector.broadcast %31 : vector<128x1xf32> to vector<128x256xf32>
    %33 = vector.broadcast %25 : vector<1x256xf32> to vector<128x256xf32>
    %34 = arith.mulf %32, %33 : vector<128x256xf32>
    %35 = arith.addf %24, %34 : vector<128x256xf32>
    %36 = vector.extract_strided_slice %4 {offsets = [3, 0], sizes = [1, 256], strides = [1, 1]} : vector<4x256xf32> to vector<1x256xf32>
    %c0_13 = arith.constant 0 : index
    %c3 = arith.constant 3 : index
    %37 = vector.load %arg3[%c0_13, %c3] : memref<128x4xf32, #tpu.memory_space<vmem>>, vector<128x1xf32>
    %38 = vector.broadcast %37 : vector<128x1xf32> to vector<128x256xf32>
    %39 = vector.broadcast %36 : vector<1x256xf32> to vector<128x256xf32>
    %40 = arith.mulf %38, %39 : vector<128x256xf32>
    %41 = arith.addf %30, %40 : vector<128x256xf32>
    %c0_14 = arith.constant 0 : index
    %c3_15 = arith.constant 3 : index
    %42 = vector.load %arg4[%c0_14, %c3_15] : memref<128x4xf32, #tpu.memory_space<vmem>>, vector<128x1xf32>
    %43 = vector.broadcast %42 : vector<128x1xf32> to vector<128x256xf32>
    %44 = vector.broadcast %36 : vector<1x256xf32> to vector<128x256xf32>
    %45 = arith.mulf %43, %44 : vector<128x256xf32>
    %46 = arith.addf %35, %45 : vector<128x256xf32>
    %c0_16 = arith.constant 0 : index
    %c0_17 = arith.constant 0 : index
    %47 = vector.load %arg9[%c0_16, %c0_17] : memref<128x1xf32, #tpu.memory_space<vmem>>, vector<128x1xf32>
    %cst = arith.constant dense<0xFF800000> : vector<128xf32>
    %48 = vector.multi_reduction <maximumf>, %41, %cst [1] : vector<128x256xf32> to vector<128xf32>
    %49 = vector.shape_cast %48 : vector<128xf32> to vector<128x1xf32>
    %50 = arith.maximumf %47, %49 : vector<128x1xf32>
    %c0_18 = arith.constant 0 : index
    %c0_19 = arith.constant 0 : index
    %51 = vector.load %arg9[%c0_18, %c0_19] : memref<128x1xf32, #tpu.memory_space<vmem>>, vector<128x1xf32>
    %52 = arith.subf %51, %50 : vector<128x1xf32>
    %53 = math.exp %52 : vector<128x1xf32>
    %54 = vector.broadcast %50 : vector<128x1xf32> to vector<128x256xf32>
    %55 = arith.subf %41, %54 : vector<128x256xf32>
    %56 = math.exp %55 : vector<128x256xf32>
    %c0_20 = arith.constant 0 : index
    %c0_21 = arith.constant 0 : index
    %57 = vector.load %arg11[%c0_20, %c0_21] : memref<128x128xf32, #tpu.memory_space<vmem>>, vector<128x128xf32>
    %58 = vector.broadcast %53 : vector<128x1xf32> to vector<128x128xf32>
    %59 = arith.mulf %58, %57 : vector<128x128xf32>
    %60 = arith.truncf %56 : vector<128x256xf32> to vector<128x256xbf16>
    %61 = arith.truncf %46 : vector<128x256xf32> to vector<128x256xbf16>
    %cst_22 = arith.constant dense<0.000000e+00> : vector<128x128xf32>
    %62 = tpu.matmul %60, %61, %cst_22 {dimension_numbers = #tpu.dot_dimension_numbers<[1], [1], [0], [0], [0, 0, 1, 0], [], []>} : vector<128x256xbf16>, vector<128x256xbf16>, vector<128x128xf32> -> vector<128x128xf32>
    %63 = arith.addf %59, %62 : vector<128x128xf32>
    %c0_23 = arith.constant 0 : index
    %c0_24 = arith.constant 0 : index
    %64 = vector.load %arg11[%c0_23, %c0_24] : memref<128x128xf32, #tpu.memory_space<vmem>>, vector<128x128xf32>
    tpu.vector_store %arg11[%c0_23, %c0_24], %63 {strides = array<i32>} : memref<128x128xf32, #tpu.memory_space<vmem>>, vector<128x128xf32>,
    %c0_25 = arith.constant 0 : index
    %c0_26 = arith.constant 0 : index
    %65 = vector.load %arg10[%c0_25, %c0_26] : memref<128x1xf32, #tpu.memory_space<vmem>>, vector<128x1xf32>
    %66 = arith.mulf %53, %65 : vector<128x1xf32>
    %cst_27 = arith.constant dense<0.000000e+00> : vector<128xf32>
    %67 = vector.multi_reduction <add>, %56, %cst_27 [1] : vector<128x256xf32> to vector<128xf32>
    %68 = vector.shape_cast %67 : vector<128xf32> to vector<128x1xf32>
    %69 = arith.addf %66, %68 : vector<128x1xf32>
    %c0_28 = arith.constant 0 : index
    %c0_29 = arith.constant 0 : index
    %70 = vector.load %arg10[%c0_28, %c0_29] : memref<128x1xf32, #tpu.memory_space<vmem>>, vector<128x1xf32>
    tpu.vector_store %arg10[%c0_28, %c0_29], %69 {strides = array<i32>} : memref<128x1xf32, #tpu.memory_space<vmem>>, vector<128x1xf32>,
    %c0_30 = arith.constant 0 : index
    %c0_31 = arith.constant 0 : index
    %71 = vector.load %arg9[%c0_30, %c0_31] : memref<128x1xf32, #tpu.memory_space<vmem>>, vector<128x1xf32>
    tpu.vector_store %arg9[%c0_30, %c0_31], %50 {strides = array<i32>} : memref<128x1xf32, #tpu.memory_space<vmem>>, vector<128x1xf32>,
    %c0_i32_32 = arith.constant 0 : i32
    %72 = arith.cmpi eq, %arg1, %c0_i32_32 : i32
    %73 = arith.extui %72 : i1 to i32
    %c0_i32_33 = arith.constant 0 : i32
    %74 = arith.cmpi ne, %73, %c0_i32_33 : i32
    scf.if %74 {
      %c0_34 = arith.constant 0 : index
      %c0_35 = arith.constant 0 : index
      %75 = vector.load %arg11[%c0_34, %c0_35] : memref<128x128xf32, #tpu.memory_space<vmem>>, vector<128x128xf32>
      %c0_36 = arith.constant 0 : index
      %c0_37 = arith.constant 0 : index
      %76 = vector.load %arg7[%c0_36, %c0_37] : memref<128x128xf32, #tpu.memory_space<vmem>>, vector<128x128xf32>
      %77 = arith.mulf %75, %76 : vector<128x128xf32>
      %c0_38 = arith.constant 0 : index
      %c0_39 = arith.constant 0 : index
      %78 = vector.load %arg6[%c0_38, %c0_39] : memref<4x128xf32, #tpu.memory_space<vmem>>, vector<4x128xf32>
      %cst_40 = arith.constant dense<0.000000e+00> : vector<4x128xf32>
      %79 = tpu.matmul %78, %77, %cst_40 {dimension_numbers = #tpu.dot_dimension_numbers<[1], [1], [0], [0], [0, 0, 1, 0], [], []>} : vector<4x128xf32>, vector<128x128xf32>, vector<4x128xf32> -> vector<4x128xf32>
      %c0_41 = arith.constant 0 : index
      %c0_42 = arith.constant 0 : index
      %80 = vector.load %arg5[%c0_41, %c0_42] : memref<128x4xf32, #tpu.memory_space<vmem>>, vector<128x4xf32>
      %c0_43 = arith.constant 0 : index
      %c0_44 = arith.constant 0 : index
      %81 = vector.load %arg10[%c0_43, %c0_44] : memref<128x1xf32, #tpu.memory_space<vmem>>, vector<128x1xf32>
      %cst_45 = arith.constant 1.000000e+00 : f32
      %82 = vector.broadcast %cst_45 : f32 to vector<128x1xf32>
      %83 = arith.divf %82, %81 : vector<128x1xf32>
      %84 = vector.broadcast %83 : vector<128x1xf32> to vector<128x4xf32>
      %85 = arith.mulf %80, %84 : vector<128x4xf32>
      %cst_46 = arith.constant dense<0.000000e+00> : vector<4x4xf32>
      %86 = tpu.matmul %79, %85, %cst_46 {dimension_numbers = #tpu.dot_dimension_numbers<[1], [0], [0], [1], [0, 0, 1, 1], [], []>} : vector<4x128xf32>, vector<128x4xf32>, vector<4x4xf32> -> vector<4x4xf32>
      %c0_47 = arith.constant 0 : index
      %c0_48 = arith.constant 0 : index
      %c0_49 = arith.constant 0 : index
      %87 = vector.load %arg8[%c0_47, %c0_48, %c0_49] : memref<1x4x4xf32, #tpu.memory_space<vmem>>, vector<1x4x4xf32>
      %88 = vector.shape_cast %87 : vector<1x4x4xf32> to vector<4x4xf32>
      %89 = vector.shape_cast %86 : vector<4x4xf32> to vector<1x4x4xf32>
      tpu.vector_store %arg8[%c0_47, %c0_48, %c0_49], %89 {strides = array<i32>} : memref<1x4x4xf32, #tpu.memory_space<vmem>>, vector<1x4x4xf32>,
    } else {
    }
    return
  }
  func.func @transform_0(%arg0: i32, %arg1: i32) -> (i32, i32, i32) {
    %c0_i32 = arith.constant 0 : i32
    %c0_i32_0 = arith.constant 0 : i32
    return %arg0, %c0_i32, %arg1 : i32, i32, i32
  }
  func.func @transform_1(%arg0: i32, %arg1: i32) -> (i32, i32) {
    %c0_i32 = arith.constant 0 : i32
    %c0_i32_0 = arith.constant 0 : i32
    %c0_i32_1 = arith.constant 0 : i32
    return %c0_i32, %c0_i32_0 : i32, i32
  }
  func.func @transform_2(%arg0: i32, %arg1: i32) -> (i32, i32) {
    %c0_i32 = arith.constant 0 : i32
    %c0_i32_0 = arith.constant 0 : i32
    %c0_i32_1 = arith.constant 0 : i32
    return %c0_i32, %c0_i32_0 : i32, i32
  }
  func.func @transform_3(%arg0: i32, %arg1: i32) -> (i32, i32) {
    %c0_i32 = arith.constant 0 : i32
    %c0_i32_0 = arith.constant 0 : i32
    %c0_i32_1 = arith.constant 0 : i32
    return %c0_i32, %c0_i32_0 : i32, i32
  }
  func.func @transform_4(%arg0: i32, %arg1: i32) -> (i32, i32) {
    %c0_i32 = arith.constant 0 : i32
    %c0_i32_0 = arith.constant 0 : i32
    %c0_i32_1 = arith.constant 0 : i32
    return %c0_i32, %c0_i32_0 : i32, i32
  }
  func.func @transform_5(%arg0: i32, %arg1: i32) -> (i32, i32) {
    %c0_i32 = arith.constant 0 : i32
    %c0_i32_0 = arith.constant 0 : i32
    %c0_i32_1 = arith.constant 0 : i32
    return %c0_i32, %c0_i32_0 : i32, i32
  }
  func.func @transform_6(%arg0: i32, %arg1: i32) -> (i32, i32, i32) {
    %c0_i32 = arith.constant 0 : i32
    %c0_i32_0 = arith.constant 0 : i32
    %c0_i32_1 = arith.constant 0 : i32
    return %arg0, %c0_i32, %c0_i32_0 : i32, i32, i32
  }
}

</mosaic_0001>

<bundles_post_ra>
// kernel: tpu_custom_call.1
= control target key start
LH: loop header
LB: loop body
LE: loop exit
PB: predicated region body
PF: predicated region fallthrough
CT: control target
= control target key end

     0   :  { %11 = vsyncpa [#allocation6], 0  ;;  %s4748_s0 = inlined_call_operand.vmem [shape: f32[2,4,256], index: 0, kind: input, shape index: {}]   ;;  %s4749_s1 = inlined_call_operand.vmem [shape: f32[128,4], index: 1, kind: input, shape index: {}]   ;;  %s4750_s2 = inlined_call_operand.vmem [shape: f32[128,4], index: 2, kind: input, shape index: {}]   ;;  %s4751_s3 = inlined_call_operand.vmem [shape: f32[128,4], index: 3, kind: input, shape index: {}]   ;;  %s4752_s4 = inlined_call_operand.vmem [shape: f32[4,128], index: 4, kind: input, shape index: {}]   ;;  %s4753_s5 = inlined_call_operand.vmem [shape: f32[128,128], index: 5, kind: input, shape index: {}]   ;;  %s4754_s6 = inlined_call_operand.hbm [shape: f32[2,4,4], index: 6, kind: output, shape index: {}]  }
   0x1   :  { %13 = vsyncpa [#allocation6 + $0x1], 0  ;;  %s3060_s21 = smov 0   ;;  %s3062_s22 = smov 0  }
   0x2   :  { %s3064_s23 = smov 0   ;;  %s3066_s24 = smov 0  }
   0x3   :  { %s3068_s25 = smov 0   ;;  %s3070_s26 = smov 0  }
   0x4 LB: > { %s2577_s27 = sadd.s32 4294967295, %s3015_s26   ;;  %s2578_s28 = sadd.s32 4294967294, %s3015_s26   ;;  %s3015_s26 = sphi %s3070_s26, %s19_s26   ;;  %s3011_s25 = sphi %s3068_s25, %s5005_s25   ;;  %s3007_s24 = sphi %s3066_s24, %s5004_s24   ;;  %s3003_s23 = sphi %s3064_s23, %s5003_s23   ;;  %s2999_s22 = sphi %s3062_s22, %s5002_s22   ;;  %s2995_s21 = sphi %s3060_s21, %s5001_s21  }
   0x5   : > { %s31_s29 = sadd.s32 1, %s3011_s25  ;;  %s171_s30 = sadd.s32 1, %s3003_s23 }
   0x6   : > { %p33_p0 = scmp.ge.s32.totalorder %s31_s29, 2  ;;  %p181_p1 = scmp.ne.s32.totalorder %s3003_s23, %s2999_s22 }
   0x7   : > { %p182_p2 = scmp.eq.s32.totalorder %s2577_s27, 1  ;;  %p187_p3 = scmp.ne.s32.totalorder %s2999_s22, %s2995_s21 }
   0x8   : > { %s5007_s29 = smov (%p33_p0, %s31_s29), 0  ;;  %p188_p5 = scmp.eq.s32.totalorder %s2578_s28, 1 }
   0x9   : > { %p3100_p4 = por %p182_p2, %p181_p1  ;;  %s168_s8 = ssub.s32 %s3011_s25, %s5007_s29 }
   0xa   : > { %p2581_p6 = scmp.ge.s32.totalorder %s3015_s26, 1  ;;  %p169_p7 = scmp.eq.s32.totalorder %s168_s8, 0 }
   0xb   : > { %p3107_p8 = por %p188_p5, %p187_p3  ;;  %p234_p9 = scmp.lt.s32.totalorder %s3015_s26, 3 }
   0xc   : > { %s3113_s10 = scalar_select %p169_p7, %s3003_s23, %s171_s30  }
   0xd   : > { %p235_p10 = pnand %p2581_p6, %p234_p9 }
   0xf   : > { %238 = sbr.rel (%p235_p10) target bundleno = 1764 (0x6e4), region = 44 }
  0x14   : > { %v335_v0 = vld [vmem:[%s4749_s1 + $0x10] sm:$0xff]  ;;  %v333_v1 = vld [vmem:[%s4749_s1] sm:$0xff]  ;;  %v4761_v2 = vmov 1   ;;  %v338_v3 = vld [vmem:[%s4749_s1 + $0x28] sm:$0xff]  ;;  %v4757_v5 = vmov 3   ;;  %v4759_v6 = vmov 2   ;;  %v430_v32 = vlaneseq }
  0x15   : > { %2760 = vset.pattern.permute.xlu0 %v4761_v2  ;;  %2756 = vset.pattern.permute.xlu1 %v4761_v2  ;;  %v334_v4 = vld [vmem:[%s4749_s1 + $0x8] sm:$0xff]  ;;  %v337_v7 = vld [vmem:[%s4749_s1 + $0x20] sm:$0xff]  ;;  %v3138_v8 = vld [vmem:[%s4749_s1 + $0x38] sm:$0xff]  ;;  %v4755_v9 = vmov 0   ;;  %p269_p11 = scmp.lt.s32.totalorder %s3007_s24, 1  ;;  %vm283_vm0 = vcmask 7168  }
  0x16   : > { %617 = vperm.xlu0 %2760, %v335_v0   ;;  %609 = vperm.xlu1 %2756, %v333_v1   ;;  %v3145_v10 = vld [vmem:[%s4749_s1 + $0x50] sm:$0xff]  ;;  %v336_v11 = vld [vmem:[%s4749_s1 + $0x18] sm:$0xff]  ;;  %v3160_v13 = vld [vmem:[%s4749_s1 + $0x48] sm:$0xff]  ;;  %v3021_v30 = vmov -inf   ;;  %v431_v35 = vshrl.u32 %v430_v32, 7  ;;  %vm3023_vm1 = vmmov 0  }
  0x17   : > { %v339_v12 = vld [vmem:[%s4749_s1 + $0x30] sm:$0xff]  ;;  %v3167_v14 = vld [vmem:[%s4749_s1 + $0x60] sm:$0xff]  ;;  %v3173_v15 = vld [vmem:[%s4749_s1 + $0x78] sm:$0xff]  ;;  %284 = vst.msk [vmem:[#allocation2] sm:$0xff] %vm283_vm0, %v3021_v30  ;;  %s270_s13 = scalar_select %p269_p11, %s3007_s24, 1  ;;  %vm2488_vm2 = vcmask 27648  }
  0x18   : > { %v3190_v16 = vld [vmem:[%s4749_s1 + $0x40] sm:$0xff]  ;;  %v3204_v17 = vld [vmem:[%s4749_s1 + $0x58] sm:$0xff]  ;;  %v3237_v27 = vld [vmem:[%s4749_s1 + $0x70] sm:$0xff]  ;;  %285 = vst.msk [vmem:[#allocation2 + $0x8] sm:$0xff] %vm283_vm0, %v3021_v30  ;;  %v674_v38 = vsub.s32 1, %v431_v35  ;;  %v678_v39 = vsub.s32 5, %v431_v35 }
  0x19   : > { %286 = vst.msk [vmem:[#allocation2 + $0x10] sm:$0xff] %vm283_vm0, %v3021_v30  ;;  %287 = vst.msk [vmem:[#allocation2 + $0x18] sm:$0xff] %vm283_vm0, %v3021_v30  ;;  %s2589_s14 = sshll.u32 %s270_s13, 3  ;;  %v432_v40 = vsub.s32 0, %v431_v35  ;;  %v1222_v43 = vsub.s32 3, %v431_v35  ;;  %v436_v44 = vsub.s32 4, %v431_v35 }
  0x1a   : > { %629 = vperm.xlu0 %2760, %v338_v3   ;;  %613 = vperm.xlu1 %2756, %v334_v4   ;;  %288 = vst.msk [vmem:[#allocation2 + $0x20] sm:$0xff] %vm283_vm0, %v3021_v30  ;;  %289 = vst.msk [vmem:[#allocation2 + $0x28] sm:$0xff] %vm283_vm0, %v3021_v30  ;;  %s276_s17 = scalar_lea.vmem %s4748_s0, %s2589_s14  ;;  %v1226_v45 = vsub.s32 7, %v431_v35  ;;  %v948_v46 = vsub.s32 2, %v431_v35  ;;  %v952_v47 = vsub.s32 6, %v431_v35  ;;  %s265_s20 = sand.u32 1, %s2999_s22  }
  0x1b   : > { %290 = vst.msk [vmem:[#allocation2 + $0x30] sm:$0xff] %vm283_vm0, %v3021_v30  ;;  %291 = vst.msk [vmem:[#allocation2 + $0x38] sm:$0xff] %vm283_vm0, %v3021_v30  ;;  %v332_v42 = vld [vmem:[%s276_s17] sm:$0xff]  ;;  %s2582_s27 = sshll.u32 %s265_s20, 2  ;;  %s2586_s28 = sshll.u32 %s3007_s24, 6 }
  0x1c   : > { %292 = vst.msk [vmem:[#allocation2 + $0x40] sm:$0xff] %vm283_vm0, %v3021_v30  ;;  %293 = vst.msk [vmem:[#allocation2 + $0x48] sm:$0xff] %vm283_vm0, %v3021_v30  ;;  %v675_v48 = vrot.slane %v332_v42, %v674_v38  ;;  %v679_v49 = vrot.slane %v332_v42, %v678_v39  ;;  %v433_v50 = vrot.slane %v332_v42, %v432_v40  ;;  %s267_s30 = scalar_lea.vmem [#allocation5], %s2582_s27  ;;  %s4702_s13 = scalar_lea.hbm %s4754_s6, %s2586_s28 }
  0x1d   : > { %294 = vst.msk [vmem:[#allocation2 + $0x50] sm:$0xff] %vm283_vm0, %v3021_v30  ;;  %295 = vst.msk [vmem:[#allocation2 + $0x58] sm:$0xff] %vm283_vm0, %v3021_v30  ;;  %v1223_v53 = vrot.slane %v332_v42, %v1222_v43  ;;  %v437_v54 = vrot.slane %v332_v42, %v436_v44  ;;  %v1227_v55 = vrot.slane %v332_v42, %v1226_v45  ;;  %s2504_s8 = sshll.u32 %s267_s30, 4  ;;  %s2491_s14 = scalar_lea.sflag [#allocation6], %s265_s20  ;;  %s4704_s8 = int_to_ptr.vmem [resolvable:$true] %s2504_s8 }
  0x1e   : > { %2766 = vset.pattern.permute.xlu0 %v4757_v5  ;;  %2757 = vset.pattern.permute.xlu1 %v4759_v6  ;;  %296 = vst.msk [vmem:[#allocation2 + $0x60] sm:$0xff] %vm283_vm0, %v3021_v30  ;;  %297 = vst.msk [vmem:[#allocation2 + $0x68] sm:$0xff] %vm283_vm0, %v3021_v30  ;;  %v949_v56 = vrot.slane %v332_v42, %v948_v46  ;;  %v953_v57 = vrot.slane %v332_v42, %v952_v47  ;;  %s2939_s15 = scalar_lea.vmem %s4704_s8, 64  ;;  %s3024_s24 = smov [#allocation5]  }
  0x1f   : > { %1161 = vperm.xlu0 %2766, %v334_v4   ;;  %887 = vperm.xlu1 %2757, %v334_v4   ;;  %298 = vst.msk [vmem:[#allocation2 + $0x70] sm:$0xff] %vm283_vm0, %v3021_v30  ;;  %299 = vst.msk [vmem:[#allocation2 + $0x78] sm:$0xff] %vm283_vm0, %v3021_v30  ;;  %v3280_v58 = vrot.slane %v675_v48, %v674_v38  ;;  %v3282_v59 = vrot.slane %v679_v49, %v674_v38  ;;  %p2940_p12 = scmp.ne.s32.totalorder %s4704_s8, %s2939_s15  ;;  %s2943_s16 = sshll.u32 %s3024_s24, 4  ;;  %s2944_s16 = int_to_ptr.vmem [resolvable:$false] %s2943_s16 }
  0x20   : > { %v3284_v60 = vrot.slane %v433_v50, %v432_v40  ;;  %v3290_v63 = vrot.slane %v1223_v53, %v1222_v43  ;;  %s2945_s17 = scalar_lea.vmem %s2944_s16, 128  ;;  %p2946_p1 = scmp.lt.s32.totalorder %s4704_s8, %s2944_s16 }
  0x21   : > { %p2941_p13 = pnand %p2940_p12, %p3100_p4  ;;  %p2947_p2 = scmp.lt.s32.totalorder %s2945_s17, %s2939_s15 }
  0x22   : > { %4846 = vst [vmem:[#allocation10_spill] sm:$0xff] %v3284_v60 }
  0x23   : > { %1173 = vperm.xlu0 %2766, %v337_v7   ;;  %2758 = vset.pattern.permute.xlu1 %v4757_v5  ;;  %p2942_p0 = pneg %p2941_p13  ;;  %p2948_p3 = por %p2947_p2, %p2946_p1 }
  0x24   : > { %1157 = vperm.xlu1 %2758, %v333_v1  }
  0x25   : > { %p2949_p5 = pnand %p2948_p3, %p2942_p0 }
  0x27   : > { %1185 = vperm.xlu0 %2766, %v3138_v8  }
  0x28   : > { %2759 = vset.pattern.permute.xlu1 %v4755_v9 }
  0x29   : > { %361 = vperm.xlu1 %2759, %v335_v0  }
  0x2b   : > { %1197 = vperm.xlu0 %2766, %v3145_v10  }
  0x2d   : > { %366 = vperm.xlu1 %2759, %v336_v11  }
  0x2f   : > { %2780 = vset.pattern.permute.xlu0 %v4759_v6 }
  0x30   : > { %883 = vperm.xlu0 %2780, %v333_v1  }
  0x31   : > { %2761 = vset.pattern.permute.xlu1 %v4761_v2 }
  0x32   : > { %621 = vperm.xlu1 %2761, %v336_v11  }
  0x34   : > { %895 = vperm.xlu0 %2780, %v336_v11  }
  0x36   : > { %2762 = vset.pattern.permute.xlu1 %v4759_v6 }
  0x37   : > { %891 = vperm.xlu1 %2762, %v335_v0  }
  0x38   : > { %907 = vperm.xlu0 %2780, %v339_v12  }
  0x3b   : > { %2763 = vset.pattern.permute.xlu1 %v4757_v5 }
  0x3c   : > { %919 = vperm.xlu0 %2780, %v3160_v13   ;;  %1165 = vperm.xlu1 %2763, %v335_v0   ;;  %v3292_v0 = vrot.slane %v437_v54, %v432_v40 }
  0x40   : > { %931 = vperm.xlu0 %2780, %v3167_v14   ;;  %1169 = vperm.xlu1 %2763, %v336_v11  }
  0x44   : > { %943 = vperm.xlu0 %2780, %v3173_v15   ;;  %2764 = vset.pattern.permute.xlu1 %v4755_v9 }
  0x45   : > { %376 = vperm.xlu1 %2764, %v338_v3  }
  0x48   : > { %2784 = vset.pattern.permute.xlu0 %v4755_v9 }
  0x49   : > { %351 = vperm.xlu0 %2784, %v333_v1   ;;  %2765 = vset.pattern.permute.xlu1 %v4761_v2  ;;  %v3294_v1 = vrot.slane %v1227_v55, %v1222_v43 }
  0x4a   : > { %625 = vperm.xlu1 %2765, %v337_v7  }
  0x4d   : > { %356 = vperm.xlu0 %2784, %v334_v4   ;;  %v3298_v4 = vrot.slane %v953_v57, %v948_v46 }
  0x4e   : > { %2767 = vset.pattern.permute.xlu1 %v4759_v6 }
  0x4f   : > { %899 = vperm.xlu1 %2767, %v337_v7  }
  0x51   : > { %371 = vperm.xlu0 %2784, %v337_v7  }
  0x53   : > { %903 = vperm.xlu1 %2767, %v338_v3  }
  0x57   : > { %2768 = vset.pattern.permute.xlu1 %v4757_v5 }
  0x58   : > { %1177 = vperm.xlu1 %2768, %v338_v3   ;;  %v3296_v3 = vrot.slane %v949_v56, %v948_v46 }
  0x5c   : > { %2769 = vset.pattern.permute.xlu1 %v4755_v9 }
  0x5d   : > { %381 = vperm.xlu1 %2769, %v339_v12  }
  0x61   : > { %2770 = vset.pattern.permute.xlu1 %v4761_v2 }
  0x62   : > { %633 = vperm.xlu1 %2770, %v339_v12  }
  0x66   : > { %637 = vperm.xlu1 %2770, %v3138_v8  }
  0x6a   : > { %2771 = vset.pattern.permute.xlu1 %v4759_v6 }
  0x6b   : > { %911 = vperm.xlu1 %2771, %v3138_v8  }
  0x6f   : > { %2772 = vset.pattern.permute.xlu1 %v4757_v5 }
  0x70   : > { %1181 = vperm.xlu1 %2772, %v339_v12  }
  0x74   : > { %2773 = vset.pattern.permute.xlu1 %v4755_v9 }
  0x75   : > { %391 = vperm.xlu1 %2773, %v3190_v16  }
  0x79   : > { %396 = vperm.xlu1 %2773, %v3160_v13  }
  0x7d   : > { %2774 = vset.pattern.permute.xlu1 %v4761_v2 }
  0x7e   : > { %645 = vperm.xlu1 %2774, %v3160_v13  }
  0x82   : > { %2775 = vset.pattern.permute.xlu1 %v4759_v6 }
  0x83   : > { %915 = vperm.xlu1 %2775, %v3190_v16  }
  0x87   : > { %2776 = vset.pattern.permute.xlu1 %v4757_v5 }
  0x88   : > { %1189 = vperm.xlu1 %2776, %v3190_v16  }
  0x8c   : > { %2777 = vset.pattern.permute.xlu1 %v4755_v9 }
  0x8d   : > { %406 = vperm.xlu1 %2777, %v3204_v17  }
  0x91   : > { %v3208_v18 = vpop.permute.xlu0 %617  ;;  %2778 = vset.pattern.permute.xlu1 %v4761_v2  ;;  %v3211_v19 = vpop.permute.xlu1 %609 }
  0x92   : > { %649 = vperm.xlu1 %2778, %v3145_v10   ;;  %v694_v7 = vmul.f32 %v3280_v58, %v3208_v18  ;;  %v695_v11 = vmul.f32 %v3282_v59, %v3208_v18  ;;  %v690_v32 = vmul.f32 %v3280_v58, %v3211_v19  ;;  %v691_v35 = vmul.f32 %v3282_v59, %v3211_v19 }
  0x95   : > { %v3214_v20 = vpop.permute.xlu0 %629  ;;  %v3216_v21 = vpop.permute.xlu1 %613 }
  0x96   : > { %2779 = vset.pattern.permute.xlu1 %v4759_v6  ;;  %v3314_v38 = vmul.f32 %v3280_v58, %v3214_v20  ;;  %v3318_v39 = vmul.f32 %v3282_v59, %v3214_v20  ;;  %v692_v18 = vmul.f32 %v3280_v58, %v3216_v21  ;;  %v693_v40 = vmul.f32 %v3282_v59, %v3216_v21 }
  0x97   : > { %923 = vperm.xlu1 %2779, %v3145_v10  }
  0x9a   : > { %v3220_v22 = vpop.permute.xlu0 %1161  ;;  %v3222_v23 = vpop.permute.xlu1 %887 }
  0x9b   : > { %2781 = vset.pattern.permute.xlu1 %v4755_v9  ;;  %v3326_v42 = vmul.f32 %v3290_v63, %v3220_v22  ;;  %v3332_v44 = vmul.f32 %v3294_v1, %v3220_v22  ;;  %v966_v20 = vmul.f32 %v3296_v3, %v3222_v23  ;;  %v967_v45 = vmul.f32 %v3298_v4, %v3222_v23 }
  0x9c   : > { %411 = vperm.xlu1 %2781, %v3167_v14  }
  0x9e   : > { %v3226_v24 = vpop.permute.xlu0 %1173 }
  0x9f   : > { %v3228_v25 = vpop.permute.xlu1 %1157  ;;  %v3341_v46 = vmul.f32 %v3290_v63, %v3226_v24 }
  0xa0   : > { %2782 = vset.pattern.permute.xlu1 %v4761_v2  ;;  %v1238_v22 = vmul.f32 %v3290_v63, %v3228_v25 }
  0xa1   : > { %657 = vperm.xlu1 %2782, %v3167_v14  }
  0xa2   : > { %v3232_v26 = vpop.permute.xlu0 %1185 }
  0xa4   : > { %v3239_v28 = vpop.permute.xlu1 %361 }
  0xa5   : > { %2783 = vset.pattern.permute.xlu1 %v4755_v9  ;;  %v452_v12 = vmul.f32 %v3284_v60, %v3239_v28  ;;  %v453_v19 = vmul.f32 %v3292_v0, %v3239_v28  ;;  %v3345_v28 = vmul.f32 %v3294_v1, %v3226_v24 }
  0xa6   : > { %v3243_v29 = vpop.permute.xlu0 %1197  ;;  %421 = vperm.xlu1 %2783, %v3237_v27  }
  0xa7   : > { %4844 = vst [vmem:[#allocation8_spill] sm:$0xff] %v3243_v29  ;;  %v726_v47 = vadd.f32 %v694_v7, %v452_v12  ;;  %v727_v54 = vadd.f32 %v695_v11, %v453_v19 }
  0xa8   : > { %v3262_v31 = vpop.permute.xlu1 %366 }
  0xa9   : > { %v454_v48 = vmul.f32 %v3284_v60, %v3262_v31  ;;  %v455_v55 = vmul.f32 %v3292_v0, %v3262_v31 }
  0xaa   : > { %426 = vperm.xlu1 %2783, %v3173_v15  }
  0xab   : > { %v3268_v33 = vpop.permute.xlu0 %883 }
  0xac   : > { %v965_v11 = vmul.f32 %v3298_v4, %v3268_v33 }
  0xad   : > { %v622_v34 = vpop.permute.xlu1 %621 }
  0xae   : > { %2786 = vset.pattern.permute.xlu1 %v4757_v5  ;;  %v696_v21 = vmul.f32 %v3280_v58, %v622_v34  ;;  %v697_v49 = vmul.f32 %v3282_v59, %v622_v34 }
  0xaf   : > { %v3271_v36 = vpop.permute.xlu0 %895 }
  0xb0   : > { %v728_v7 = vadd.f32 %v696_v21, %v454_v48  ;;  %v970_v12 = vmul.f32 %v3296_v3, %v3271_v36  ;;  %v729_v5 = vadd.f32 %v697_v49, %v455_v55 }
  0xb2   : > { %v892_v37 = vpop.permute.xlu1 %891 }
  0xb3   : > { %v3276_v41 = vpop.permute.xlu0 %907  ;;  %v968_v23 = vmul.f32 %v3296_v3, %v892_v37  ;;  %v969_v50 = vmul.f32 %v3298_v4, %v892_v37  ;;  %v964_v37 = vmul.f32 %v3296_v3, %v3268_v33 }
  0xb5   : > { %v1000_v48 = vadd.f32 %v968_v23, %v726_v47  ;;  %v1001_v6 = vadd.f32 %v969_v50, %v727_v54 }
  0xb7   : > { %v3278_v51 = vpop.permute.xlu0 %919  ;;  %v1166_v52 = vpop.permute.xlu1 %1165 }
  0xb8   : > { %4845 = vst [vmem:[#allocation9_spill] sm:$0xff] %v3278_v51  ;;  %v1242_v34 = vmul.f32 %v3290_v63, %v1166_v52  ;;  %v1243_v9 = vmul.f32 %v3294_v1, %v1166_v52  ;;  %v971_v51 = vmul.f32 %v3298_v4, %v3271_v36 }
  0xba   : > { %v3372_v33 = vadd.f32 %v1242_v34, %v1000_v48 }
  0xbb   : > { %v3286_v61 = vpop.permute.xlu0 %931  ;;  %v3288_v62 = vpop.permute.xlu1 %1169 }
  0xbc   : > { %4847 = vst [vmem:[#allocation11_spill] sm:$0xff] %v3286_v61  ;;  %4849 = vst [vmem:[#allocation13_spill] sm:$0xff] %v3372_v33 }
  0xbf   : > { %v3306_v30 = vpop.permute.xlu0 %943 }
  0xc0   : > { %4848 = vst [vmem:[#allocation12_spill] sm:$0xff] %v3306_v30  ;;  %v377_v43 = vpop.permute.xlu1 %376 }
  0xc1   : > { %v458_v47 = vmul.f32 %v3284_v60, %v377_v43 }
  0xc4   : > { %v352_v53 = vpop.permute.xlu0 %351 }
  0xc5   : > { %v448_v24 = vmul.f32 %v3284_v60, %v352_v53  ;;  %v449_v56 = vmul.f32 %v3292_v0, %v352_v53  ;;  %v626_v57 = vpop.permute.xlu1 %625  ;;  %v1239_v53 = vmul.f32 %v3294_v1, %v3228_v25  ;;  %v1244_v25 = vmul.f32 %v3290_v63, %v3288_v62 }
  0xc6   : > { %v698_v50 = vmul.f32 %v3280_v58, %v626_v57  ;;  %v699_v54 = vmul.f32 %v3282_v59, %v626_v57 }
  0xc7   : > { %v722_v31 = vadd.f32 %v690_v32, %v448_v24  ;;  %v723_v19 = vadd.f32 %v691_v35, %v449_v56  ;;  %v3374_v32 = vadd.f32 %v1243_v9, %v1001_v6  ;;  %v1002_v35 = vadd.f32 %v970_v12, %v728_v7 }
  0xc8   : > { %v357_v21 = vpop.permute.xlu0 %356  ;;  %v1245_v12 = vmul.f32 %v3294_v1, %v3288_v62 }
  0xc9   : > { %v450_v2 = vmul.f32 %v3284_v60, %v357_v21  ;;  %v451_v30 = vmul.f32 %v3292_v0, %v357_v21  ;;  %v996_v52 = vadd.f32 %v964_v37, %v722_v31  ;;  %v997_v61 = vadd.f32 %v965_v11, %v723_v19  ;;  %4850 = vst [vmem:[#allocation14_spill] sm:$0xff] %v3374_v32 }
  0xca   : > { %v900_v29 = vpop.permute.xlu1 %899  ;;  %v732_v37 = vadd.f32 %v3314_v38, %v458_v47  ;;  %v1452_v11 = vmax.f32 %v3372_v33, %v3374_v32  ;;  %v3408_v21 = vadd.f32 %v1244_v25, %v1002_v35 }
  0xcb   : > { %v724_v49 = vadd.f32 %v692_v18, %v450_v2  ;;  %v725_v23 = vadd.f32 %v693_v40, %v451_v30  ;;  %v3381_v24 = vadd.f32 %v1238_v22, %v996_v52  ;;  %v3383_v36 = vadd.f32 %v1239_v53, %v997_v61 }
  0xcc   : > { %v372_v55 = vpop.permute.xlu0 %371  ;;  %v459_v2 = vmul.f32 %v3292_v0, %v377_v43  ;;  %v972_v30 = vmul.f32 %v3296_v3, %v900_v29  ;;  %v973_v61 = vmul.f32 %v3298_v4, %v900_v29  ;;  %v1003_v43 = vadd.f32 %v971_v51, %v729_v5  ;;  %4855 = vst [vmem:[#allocation19_spill] sm:$0xff] %v3408_v21 }
  0xcd   : > { %4851 = vst [vmem:[#allocation15_spill] sm:$0xff] %v3381_v24  ;;  %4852 = vst [vmem:[#allocation16_spill] sm:$0xff] %v3383_v36  ;;  %v456_v6 = vmul.f32 %v3284_v60, %v372_v55  ;;  %v457_v9 = vmul.f32 %v3292_v0, %v372_v55  ;;  %v998_v56 = vadd.f32 %v966_v20, %v724_v49 }
  0xce   : > { %v999_v7 = vadd.f32 %v967_v45, %v725_v23  ;;  %v904_v18 = vpop.permute.xlu1 %903  ;;  %v1446_v40 = vmax.f32 %v3381_v24, %v3383_v36  ;;  %v733_v19 = vadd.f32 %v3318_v39, %v459_v2  ;;  %v4767_v2 = vmov 0.0  }
  0xcf   : > { %v730_v22 = vadd.f32 %v698_v50, %v456_v6  ;;  %v731_v57 = vadd.f32 %v699_v54, %v457_v9  ;;  %v974_v34 = vmul.f32 %v3296_v3, %v904_v18  ;;  %v975_v20 = vmul.f32 %v3298_v4, %v904_v18  ;;  %314 = vst.msk [vmem:[#allocation3 + $0x70] sm:$0xff] %vm283_vm0, %v4767_v2 }
  0xd0   : > { %1447 = vmax.xlane.f32.xlu0 %v1446_v40  ;;  %v3397_v45 = vadd.f32 %v3326_v42, %v998_v56  ;;  %v3400_v62 = vadd.f32 %v3332_v44, %v999_v7  ;;  %v3410_v42 = vadd.f32 %v1245_v12, %v1003_v43  ;;  %300 = vst.msk [vmem:[#allocation3] sm:$0xff] %vm283_vm0, %v4767_v2  ;;  %301 = vst.msk [vmem:[#allocation3 + $0x8] sm:$0xff] %vm283_vm0, %v4767_v2 }
  0xd1   : > { %v1004_v29 = vadd.f32 %v972_v30, %v730_v22  ;;  %v1005_v31 = vadd.f32 %v973_v61, %v731_v57  ;;  %v1006_v51 = vadd.f32 %v974_v34, %v732_v37  ;;  %v1007_v39 = vadd.f32 %v975_v20, %v733_v19  ;;  %302 = vst.msk [vmem:[#allocation3 + $0x10] sm:$0xff] %vm283_vm0, %v4767_v2 }
  0xd2   : > { %4853 = vst [vmem:[#allocation17_spill] sm:$0xff] %v3397_v45  ;;  %4854 = vst [vmem:[#allocation18_spill] sm:$0xff] %v3400_v62  ;;  %v1449_v53 = vmax.f32 %v3397_v45, %v3400_v62  ;;  %v1455_v25 = vmax.f32 %v3408_v21, %v3410_v42  ;;  %2624 = vmatprep.subr.mxu1 %v4767_v2  ;;  %v976_v30 = vmul.f32 %v3296_v3, %v3276_v41  ;;  %v4884_v21 = vmov 3  }
  0xd3   : > { %4856 = vst [vmem:[#allocation20_spill] sm:$0xff] %v3410_v42  ;;  %v1178_v48 = vpop.permute.xlu1 %1177  ;;  %v3413_v44 = vadd.f32 %v3341_v46, %v1004_v29  ;;  %v3416_v5 = vadd.f32 %v3345_v28, %v1005_v31  ;;  %303 = vst.msk [vmem:[#allocation3 + $0x18] sm:$0xff] %vm283_vm0, %v4767_v2  ;;  %v977_v18 = vmul.f32 %v3298_v4, %v3276_v41  ;;  %v3488_v41 = vld [vmem:[%s4749_s1 + $0x68] sm:$0xff]  ;;  %v4863_v29 = vmov 1  }
  0xd4   : > { %v1248_v38 = vmul.f32 %v3290_v63, %v1178_v48  ;;  %v1249_v52 = vmul.f32 %v3294_v1, %v1178_v48  ;;  %1450 = vmax.xlane.f32.xlu1 %v1449_v53  ;;  %1453 = vmax.xlane.f32.xlu0 %v1452_v11  ;;  %304 = vst.msk [vmem:[#allocation3 + $0x20] sm:$0xff] %vm283_vm0, %v4767_v2  ;;  %305 = vst.msk [vmem:[#allocation3 + $0x28] sm:$0xff] %vm283_vm0, %v4767_v2  ;;  %v3494_v11 = vld [vmem:[%s4750_s2 + $0x78] sm:$0xff] }
  0xd5   : > { %4857 = vst [vmem:[#allocation21_spill] sm:$0xff] %v3413_v44  ;;  %4858 = vst [vmem:[#allocation22_spill] sm:$0xff] %v3416_v5  ;;  %v1458_v35 = vmax.f32 %v3413_v44, %v3416_v5  ;;  %v1253_v5 = vmul.f32 %v3294_v1, %v3232_v26 }
  0xd6   : > { %v3424_v47 = vadd.f32 %v1248_v38, %v1006_v51  ;;  %v3426_v46 = vadd.f32 %v1249_v52, %v1007_v39  ;;  %306 = vst.msk [vmem:[#allocation3 + $0x30] sm:$0xff] %vm283_vm0, %v4767_v2  ;;  %307 = vst.msk [vmem:[#allocation3 + $0x38] sm:$0xff] %vm283_vm0, %v4767_v2 }
  0xd7   : > { %308 = vst.msk [vmem:[#allocation3 + $0x40] sm:$0xff] %vm283_vm0, %v4767_v2  ;;  %309 = vst.msk [vmem:[#allocation3 + $0x48] sm:$0xff] %vm283_vm0, %v4767_v2 }
  0xd8   : > { %4859 = vst [vmem:[#allocation23_spill] sm:$0xff] %v3424_v47  ;;  %4860 = vst [vmem:[#allocation24_spill] sm:$0xff] %v3426_v46  ;;  %1459 = vmax.xlane.f32.xlu1 %v1458_v35  ;;  %1456 = vmax.xlane.f32.xlu0 %v1455_v25  ;;  %v382_v28 = vpop.permute.xlu1 %381  ;;  %v1461_v49 = vmax.f32 %v3424_v47, %v3426_v46  ;;  %v3522_v25 = vld [vmem:[#allocation2] sm:$0xff] }
  0xd9   : > { %v460_v54 = vmul.f32 %v3284_v60, %v382_v28  ;;  %v461_v55 = vmul.f32 %v3292_v0, %v382_v28  ;;  %310 = vst.msk [vmem:[#allocation3 + $0x50] sm:$0xff] %vm283_vm0, %v4767_v2  ;;  %311 = vst.msk [vmem:[#allocation3 + $0x58] sm:$0xff] %vm283_vm0, %v4767_v2 }
  0xda   : > { %312 = vst.msk [vmem:[#allocation3 + $0x60] sm:$0xff] %vm283_vm0, %v4767_v2  ;;  %313 = vst.msk [vmem:[#allocation3 + $0x68] sm:$0xff] %vm283_vm0, %v4767_v2 }
  0xdb   : > { %315 = vst.msk [vmem:[#allocation3 + $0x78] sm:$0xff] %vm283_vm0, %v4767_v2  ;;  %4864 = vst [vmem:[#allocation27_spill] sm:$0xff] %v3522_v25 }
  0xdc   : > { %1462 = vmax.xlane.f32.xlu0 %v1461_v49 }
  0xdd   : > { %v634_v23 = vpop.permute.xlu1 %633 }
  0xde   : > { %v702_v6 = vmul.f32 %v3280_v58, %v634_v23  ;;  %v703_v9 = vmul.f32 %v3282_v59, %v634_v23  ;;  %v3527_v23 = vld [vmem:[#allocation2 + $0x8] sm:$0xff] }
  0xdf   : > { %4865 = vst [vmem:[#allocation28_spill] sm:$0xff] %v3527_v23 }
  0xe0   : > { %v734_v7 = vadd.f32 %v702_v6, %v460_v54  ;;  %v735_v12 = vadd.f32 %v703_v9, %v461_v55  ;;  %v3529_v54 = vld [vmem:[#allocation2 + $0x10] sm:$0xff] }
  0xe1   : > { %v3430_v50 = vpop.permute.xlu1 %637  ;;  %4866 = vst [vmem:[#allocation29_spill] sm:$0xff] %v3529_v54 }
  0xe2   : > { %v1008_v57 = vadd.f32 %v976_v30, %v734_v7  ;;  %v1009_v34 = vadd.f32 %v977_v18, %v735_v12  ;;  %v3539_v12 = vld [vmem:[#allocation2 + $0x20] sm:$0xff]  ;;  %v3541_v30 = vld [vmem:[#allocation2 + $0x18] sm:$0xff] }
  0xe3   : > { %4867 = vst [vmem:[#allocation30_spill] sm:$0xff] %v3539_v12  ;;  %4868 = vst [vmem:[#allocation31_spill] sm:$0xff] %v3541_v30 }
  0xe6   : > { %v3436_v56 = vpop.permute.xlu1 %911 }
  0xe7   : > { %v978_v2 = vmul.f32 %v3296_v3, %v3436_v56 }
  0xeb   : > { %v1182_v40 = vpop.permute.xlu1 %1181 }
  0xec   : > { %v1250_v61 = vmul.f32 %v3290_v63, %v1182_v40  ;;  %v1251_v22 = vmul.f32 %v3294_v1, %v1182_v40 }
  0xee   : > { %v3477_v20 = vadd.f32 %v1250_v61, %v1008_v57  ;;  %v3479_v43 = vadd.f32 %v1251_v22, %v1009_v34  ;;  %v3553_v57 = vld [vmem:[#allocation2 + $0x28] sm:$0xff] }
  0xef   : > { %4869 = vst [vmem:[#allocation32_spill] sm:$0xff] %v3553_v57 }
  0xf0   : > { %4861 = vst [vmem:[#allocation25_spill] sm:$0xff] %v3477_v20  ;;  %4862 = vst [vmem:[#allocation26_spill] sm:$0xff] %v3479_v43  ;;  %v1464_v37 = vmax.f32 %v3477_v20, %v3479_v43  ;;  %v1252_v43 = vmul.f32 %v3290_v63, %v3232_v26 }
  0xf2   : > { %386 = vperm.xlu0 %2784, %v3138_v8   ;;  %1465 = vmax.xlane.f32.xlu1 %v1464_v37  ;;  %v392_v8 = vpop.permute.xlu1 %391 }
  0xf6   : > { %401 = vperm.xlu0 %2784, %v3145_v10   ;;  %v3500_v10 = vpop.permute.xlu1 %396 }
  0xfa   : > { %416 = vperm.xlu0 %2784, %v3488_v41   ;;  %v3502_v31 = vpop.permute.xlu1 %645 }
  0xfe   : > { %573 = vperm.xlu0 %2784, %v3494_v11   ;;  %v3504_v19 = vpop.permute.xlu1 %915 }
 0x102   : > { %2785 = vset.pattern.permute.xlu0 %v4863_v29 }
 0x103   : > { %641 = vperm.xlu0 %2785, %v3190_v16   ;;  %v3506_v53 = vpop.permute.xlu1 %1189 }
 0x107   : > { %653 = vperm.xlu0 %2785, %v3204_v17  }
 0x108   : > { %v3508_v48 = vpop.permute.xlu1 %406 }
 0x10d   : > { %v3510_v51 = vpop.permute.xlu1 %649 }
 0x112   : > { %v3512_v38 = vpop.permute.xlu1 %923 }
 0x117   : > { %v3514_v52 = vpop.permute.xlu1 %411 }
 0x11c   : > { %v3516_v16 = vpop.permute.xlu1 %657 }
 0x121   : > { %v3518_v39 = vpop.permute.xlu1 %421 }
 0x125   : > { %v3520_v35 = vpop.permute.xlu1 %426 }
 0x159   : > { %v1448_v28 = vpop.xlane.xlu0 %1447 }
 0x15a   : > { %v3525_v49 = vmax.f32 %v3522_v25, %v1448_v28 }
 0x15c   : > { %2120 = vst.msk [vmem:[#allocation2] sm:$0xff] %vm283_vm0, %v3525_v49 }
 0x15d   : > { %v1451_v55 = vpop.xlane.xlu1 %1450  ;;  %v1454_v6 = vpop.xlane.xlu0 %1453 }
 0x15e   : > { %v3534_v9 = vmax.f32 %v3527_v23, %v1451_v55  ;;  %v3537_v7 = vmax.f32 %v3529_v54, %v1454_v6  ;;  %v704_v55 = vmul.f32 %v3280_v58, %v3430_v50  ;;  %v705_v6 = vmul.f32 %v3282_v59, %v3430_v50 }
 0x160   : > { %2121 = vst.msk [vmem:[#allocation2 + $0x8] sm:$0xff] %vm283_vm0, %v3534_v9  ;;  %2122 = vst.msk [vmem:[#allocation2 + $0x10] sm:$0xff] %vm283_vm0, %v3537_v7 }
 0x161   : > { %v1460_v18 = vpop.xlane.xlu1 %1459  ;;  %v1457_v40 = vpop.xlane.xlu0 %1456 }
 0x162   : > { %v3548_v61 = vmax.f32 %v3539_v12, %v1460_v18  ;;  %v3551_v22 = vmax.f32 %v3541_v30, %v1457_v40 }
 0x164   : > { %2124 = vst.msk [vmem:[#allocation2 + $0x20] sm:$0xff] %vm283_vm0, %v3548_v61  ;;  %2123 = vst.msk [vmem:[#allocation2 + $0x18] sm:$0xff] %vm283_vm0, %v3551_v22 }
 0x165   : > { %v1463_v34 = vpop.xlane.xlu0 %1462 }
 0x166   : > { %v3560_v37 = vmax.f32 %v3553_v57, %v1463_v34  ;;  %v979_v34 = vmul.f32 %v3298_v4, %v3436_v56 }
 0x168   : > { %2125 = vst.msk [vmem:[#allocation2 + $0x28] sm:$0xff] %vm283_vm0, %v3560_v37 }
 0x16d   : > { %v387_v28 = vpop.permute.xlu0 %386 }
 0x16e   : > { %v462_v18 = vmul.f32 %v3284_v60, %v387_v28  ;;  %v463_v40 = vmul.f32 %v3292_v0, %v387_v28 }
 0x170   : > { %v736_v20 = vadd.f32 %v704_v55, %v462_v18  ;;  %v737_v46 = vadd.f32 %v705_v6, %v463_v40  ;;  %v3588_v6 = vld [vmem:[#allocation2 + $0x30] sm:$0xff] }
 0x171   : > { %v402_v47 = vpop.permute.xlu0 %401  ;;  %4872 = vst [vmem:[#allocation35_spill] sm:$0xff] %v3588_v6 }
 0x172   : > { %v1010_v50 = vadd.f32 %v978_v2, %v736_v20  ;;  %v1011_v44 = vadd.f32 %v979_v34, %v737_v46  ;;  %v980_v20 = vmul.f32 %v3296_v3, %v3504_v19  ;;  %v1254_v34 = vmul.f32 %v3290_v63, %v3506_v53 }
 0x174   : > { %v3578_v32 = vadd.f32 %v1252_v43, %v1010_v50  ;;  %v3580_v28 = vadd.f32 %v1253_v5, %v1011_v44  ;;  %v464_v44 = vmul.f32 %v3284_v60, %v392_v8  ;;  %v465_v5 = vmul.f32 %v3292_v0, %v392_v8 }
 0x175   : > { %v3582_v33 = vpop.permute.xlu0 %416  ;;  %v981_v43 = vmul.f32 %v3298_v4, %v3504_v19  ;;  %v1255_v50 = vmul.f32 %v3294_v1, %v3506_v53  ;;  %v3640_v19 = vld [vmem:[%s4750_s2 + $0x58] sm:$0xff]  ;;  %v4875_v53 = vmov 2  }
 0x176   : > { %4870 = vst [vmem:[#allocation33_spill] sm:$0xff] %v3578_v32  ;;  %4871 = vst [vmem:[#allocation34_spill] sm:$0xff] %v3580_v28  ;;  %v1467_v56 = vmax.f32 %v3578_v32, %v3580_v28  ;;  %v474_v23 = vmul.f32 %v3284_v60, %v3582_v33  ;;  %v475_v25 = vmul.f32 %v3292_v0, %v3582_v33 }
 0x178   : > { %1468 = vmax.xlane.f32.xlu0 %v1467_v56 }
 0x179   : > { %v3586_v55 = vpop.permute.xlu0 %573 }
 0x17b   : > { %v1466_v18 = vpop.xlane.xlu1 %1465 }
 0x17c   : > { %v3591_v40 = vmax.f32 %v3588_v6, %v1466_v18 }
 0x17e   : > { %2126 = vst.msk [vmem:[#allocation2 + $0x30] sm:$0xff] %vm283_vm0, %v3591_v40  ;;  %v642_v26 = vpop.permute.xlu0 %641 }
 0x17f   : > { %v706_v46 = vmul.f32 %v3280_v58, %v642_v26  ;;  %v707_v2 = vmul.f32 %v3282_v59, %v642_v26 }
 0x181   : > { %v738_v56 = vadd.f32 %v706_v46, %v464_v44  ;;  %v739_v18 = vadd.f32 %v707_v2, %v465_v5  ;;  %v710_v44 = vmul.f32 %v3280_v58, %v3510_v51  ;;  %v711_v5 = vmul.f32 %v3282_v59, %v3510_v51 }
 0x182   : > { %v468_v46 = vmul.f32 %v3284_v60, %v402_v47  ;;  %v469_v2 = vmul.f32 %v3292_v0, %v402_v47 }
 0x183   : > { %v1012_v32 = vadd.f32 %v980_v20, %v738_v56  ;;  %v1013_v8 = vadd.f32 %v981_v43, %v739_v18  ;;  %v984_v20 = vmul.f32 %v3296_v3, %v3512_v38  ;;  %v985_v43 = vmul.f32 %v3298_v4, %v3512_v38  ;;  %v3667_v38 = vpop.permute.xlu0 %653 }
 0x185   : > { %v3607_v28 = vadd.f32 %v1254_v34, %v1012_v32  ;;  %v3609_v42 = vadd.f32 %v1255_v50, %v1013_v8  ;;  %v3621_v32 = vld [vmem:[%s4750_s2 + $0x70] sm:$0xff]  ;;  %v742_v34 = vadd.f32 %v710_v44, %v468_v46  ;;  %v743_v50 = vadd.f32 %v711_v5, %v469_v2  ;;  %v4876_v8 = vld [vmem:[#allocation8_spill] sm:$0xff]  ;;  %v3670_v44 = vld [vmem:[#allocation2 + $0x38] sm:$0xff] }
 0x186   : > { %v1259_v51 = vmul.f32 %v3294_v1, %v4876_v8  ;;  %4879 = vst [vmem:[#allocation39_spill] sm:$0xff] %v3670_v44  ;;  %v466_v2 = vmul.f32 %v3284_v60, %v3500_v10 }
 0x187   : > { %4873 = vst [vmem:[#allocation36_spill] sm:$0xff] %v3607_v28  ;;  %4874 = vst [vmem:[#allocation37_spill] sm:$0xff] %v3609_v42  ;;  %v1470_v26 = vmax.f32 %v3607_v28, %v3609_v42  ;;  %v1016_v56 = vadd.f32 %v984_v20, %v742_v34  ;;  %v1017_v18 = vadd.f32 %v985_v43, %v743_v50  ;;  %v3694_v50 = vld [vmem:[#allocation2 + $0x40] sm:$0xff] }
 0x188   : > { %v467_v20 = vmul.f32 %v3292_v0, %v3500_v10  ;;  %v708_v43 = vmul.f32 %v3280_v58, %v3502_v31  ;;  %v709_v34 = vmul.f32 %v3282_v59, %v3502_v31  ;;  %4880 = vst [vmem:[#allocation40_spill] sm:$0xff] %v3694_v50  ;;  %v3708_v31 = vld [vmem:[%s4750_s2 + $0x48] sm:$0xff] }
 0x189   : > { %1471 = vmax.xlane.f32.xlu1 %v1470_v26  ;;  %v1258_v26 = vmul.f32 %v3290_v63, %v4876_v8  ;;  %v3660_v42 = vadd.f32 %v1259_v51, %v1017_v18  ;;  %v4881_v51 = vld [vmem:[#allocation9_spill] sm:$0xff] }
 0x18a   : > { %v740_v8 = vadd.f32 %v708_v43, %v466_v2 }
 0x18b   : > { %v3658_v28 = vadd.f32 %v1258_v26, %v1016_v56  ;;  %4878 = vst [vmem:[#allocation38_spill] sm:$0xff] %v3660_v42  ;;  %v3699_v56 = vld [vmem:[%s4750_s2 + $0x40] sm:$0xff]  ;;  %v741_v26 = vadd.f32 %v709_v34, %v467_v20 }
 0x18d   : > { %4877 = vst [vmem:[#allocation8_spill] sm:$0xff] %v3658_v28  ;;  %v1476_v47 = vmax.f32 %v3658_v28, %v3660_v42 }
 0x19a   : > { %1193 = vperm.xlu1 %2786, %v3160_v13   ;;  %v3628_v13 = vld [vmem:[%s4750_s2 + $0x60] sm:$0xff] }
 0x19e   : > { %1201 = vperm.xlu1 %2786, %v3204_v17  }
 0x1a2   : > { %1205 = vperm.xlu1 %2786, %v3167_v14   ;;  %v3634_v14 = vld [vmem:[%s4750_s2 + $0x50] sm:$0xff] }
 0x1a6   : > { %1213 = vperm.xlu1 %2786, %v3237_v27  }
 0x1aa   : > { %1217 = vperm.xlu1 %2786, %v3173_v15  }
 0x1ae   : > { %1359 = vperm.xlu1 %2786, %v3621_v32  }
 0x1b2   : > { %1363 = vperm.xlu1 %2786, %v3494_v11  }
 0x1b6   : > { %1351 = vperm.xlu1 %2786, %v3628_v13  }
 0x1ba   : > { %1343 = vperm.xlu1 %2786, %v3634_v14  }
 0x1be   : > { %1347 = vperm.xlu1 %2786, %v3640_v19  }
 0x1c2   : > { %2787 = vset.pattern.permute.xlu1 %v4875_v53 }
 0x1e2   : > { %1477 = vmax.xlane.f32.xlu1 %v1476_v47  ;;  %v982_v47 = vmul.f32 %v3296_v3, %v4881_v51 }
 0x1e4   : > { %v1014_v34 = vadd.f32 %v982_v47, %v740_v8  ;;  %v473_v8 = vmul.f32 %v3292_v0, %v3514_v52  ;;  %v715_v47 = vmul.f32 %v3282_v59, %v3516_v16 }
 0x1f3   : > { %927 = vperm.xlu1 %2787, %v3204_v17   ;;  %v3681_v17 = vld [vmem:[%s4750_s2 + $0x68] sm:$0xff] }
 0x1f7   : > { %935 = vperm.xlu1 %2787, %v3488_v41  }
 0x1fb   : > { %939 = vperm.xlu1 %2787, %v3237_v27  }
 0x1ff   : > { %1085 = vperm.xlu1 %2787, %v3621_v32  }
 0x201   : > { %v1469_v5 = vpop.xlane.xlu0 %1468 }
 0x202   : > { %v3673_v46 = vmax.f32 %v3670_v44, %v1469_v5  ;;  %v983_v5 = vmul.f32 %v3298_v4, %v4881_v51 }
 0x203   : > { %1089 = vperm.xlu1 %2787, %v3494_v11  }
 0x204   : > { %2127 = vst.msk [vmem:[#allocation2 + $0x38] sm:$0xff] %vm283_vm0, %v3673_v46 }
 0x207   : > { %1081 = vperm.xlu1 %2787, %v3681_v17  }
 0x20b   : > { %1069 = vperm.xlu1 %2787, %v3634_v14  }
 0x20f   : > { %1073 = vperm.xlu1 %2787, %v3640_v19  }
 0x212   : > { %v1472_v18 = vpop.xlane.xlu1 %1471 }
 0x213   : > { %v3702_v10 = vmax.f32 %v3694_v50, %v1472_v18  ;;  %1061 = vperm.xlu1 %2787, %v3699_v56   ;;  %v1015_v18 = vadd.f32 %v983_v5, %v741_v26  ;;  %v714_v26 = vmul.f32 %v3280_v58, %v3516_v16  ;;  %v478_v50 = vmul.f32 %v3284_v60, %v3520_v35 }
 0x215   : > { %2128 = vst.msk [vmem:[#allocation2 + $0x40] sm:$0xff] %vm283_vm0, %v3702_v10 }
 0x216   : > { %v1194_v2 = vpop.permute.xlu1 %1193 }
 0x217   : > { %v1256_v20 = vmul.f32 %v3290_v63, %v1194_v2  ;;  %v1257_v43 = vmul.f32 %v3294_v1, %v1194_v2  ;;  %1065 = vperm.xlu1 %2787, %v3708_v31   ;;  %v472_v2 = vmul.f32 %v3284_v60, %v3514_v52 }
 0x219   : > { %v3719_v28 = vadd.f32 %v1256_v20, %v1014_v34  ;;  %v3721_v42 = vadd.f32 %v1257_v43, %v1015_v18  ;;  %v746_v20 = vadd.f32 %v714_v26, %v472_v2  ;;  %v747_v43 = vadd.f32 %v715_v47, %v473_v8  ;;  %v4885_v34 = vld [vmem:[#allocation11_spill] sm:$0xff] }
 0x21a   : > { %v1202_v62 = vpop.permute.xlu1 %1201  ;;  %v988_v18 = vmul.f32 %v3296_v3, %v4885_v34 }
 0x21b   : > { %4882 = vst [vmem:[#allocation9_spill] sm:$0xff] %v3719_v28  ;;  %4883 = vst [vmem:[#allocation41_spill] sm:$0xff] %v3721_v42  ;;  %2789 = vset.pattern.permute.xlu1 %v4884_v21  ;;  %v1473_v51 = vmax.f32 %v3719_v28, %v3721_v42 }
 0x21c   : > { %1339 = vperm.xlu1 %2789, %v3708_v31   ;;  %v1020_v52 = vadd.f32 %v988_v18, %v746_v20 }
 0x21d   : > { %1474 = vmax.xlane.f32.xlu0 %v1473_v51  ;;  %v989_v51 = vmul.f32 %v3298_v4, %v4885_v34  ;;  %v713_v34 = vmul.f32 %v3282_v59, %v3667_v38 }
 0x21e   : > { %v1206_v5 = vpop.permute.xlu1 %1205 }
 0x21f   : > { %v1262_v28 = vmul.f32 %v3290_v63, %v1206_v5  ;;  %v1263_v42 = vmul.f32 %v3294_v1, %v1206_v5  ;;  %v1021_v45 = vadd.f32 %v989_v51, %v747_v43  ;;  %v3768_v5 = vld [vmem:[#allocation2 + $0x50] sm:$0xff]  ;;  %v471_v43 = vmul.f32 %v3292_v0, %v3508_v48 }
 0x220   : > { %2790 = vset.pattern.permute.xlu1 %v4863_v29  ;;  %4893 = vst [vmem:[#allocation48_spill] sm:$0xff] %v3768_v5 }
 0x221   : > { %v3742_v36 = vadd.f32 %v1262_v28, %v1020_v52  ;;  %v3744_v24 = vadd.f32 %v1263_v42, %v1021_v45 }
 0x222   : > { %v3748_v2 = vpop.permute.xlu1 %1213 }
 0x223   : > { %4886 = vst [vmem:[#allocation11_spill] sm:$0xff] %v3742_v36  ;;  %4887 = vst [vmem:[#allocation42_spill] sm:$0xff] %v3744_v24  ;;  %v1482_v16 = vmax.f32 %v3742_v36, %v3744_v24  ;;  %v1260_v24 = vmul.f32 %v3290_v63, %v1202_v62  ;;  %v1267_v33 = vmul.f32 %v3294_v1, %v3748_v2 }
 0x226   : > { %v3750_v8 = vpop.permute.xlu1 %1217 }
 0x22a   : > { %v3752_v26 = vpop.permute.xlu1 %1359 }
 0x22b   : > { %4888 = vst [vmem:[#allocation43_spill] sm:$0xff] %v3752_v26 }
 0x22e   : > { %v3755_v47 = vpop.permute.xlu1 %1363 }
 0x22f   : > { %4889 = vst [vmem:[#allocation44_spill] sm:$0xff] %v3755_v47  ;;  %v1266_v47 = vmul.f32 %v3290_v63, %v3748_v2 }
 0x232   : > { %v3759_v45 = vpop.permute.xlu1 %1351 }
 0x233   : > { %4890 = vst [vmem:[#allocation45_spill] sm:$0xff] %v3759_v45 }
 0x236   : > { %v3762_v42 = vpop.permute.xlu1 %1343 }
 0x237   : > { %4891 = vst [vmem:[#allocation46_spill] sm:$0xff] %v3762_v42  ;;  %v3793_v42 = vld [vmem:[%s4750_s2 + $0x30] sm:$0xff] }
 0x23a   : > { %v3766_v28 = vpop.permute.xlu1 %1347 }
 0x23b   : > { %4892 = vst [vmem:[#allocation47_spill] sm:$0xff] %v3766_v28 }
 0x240   : > { %1483 = vmax.xlane.f32.xlu1 %v1482_v16  ;;  %v745_v16 = vadd.f32 %v713_v34, %v471_v43 }
 0x251   : > { %661 = vperm.xlu1 %2790, %v3488_v41  }
 0x255   : > { %669 = vperm.xlu1 %2790, %v3173_v15   ;;  %v470_v15 = vmul.f32 %v3284_v60, %v3508_v48 }
 0x259   : > { %811 = vperm.xlu1 %2790, %v3621_v32  }
 0x25d   : > { %815 = vperm.xlu1 %2790, %v3494_v11   ;;  %v712_v11 = vmul.f32 %v3280_v58, %v3667_v38  ;;  %v1261_v38 = vmul.f32 %v3294_v1, %v1202_v62  ;;  %v3805_v62 = vld [vmem:[%s4750_s2 + $0x38] sm:$0xff] }
 0x25f   : > { %v744_v52 = vadd.f32 %v712_v11, %v470_v15 }
 0x261   : > { %803 = vperm.xlu1 %2790, %v3628_v13  }
 0x265   : > { %807 = vperm.xlu1 %2790, %v3681_v17  }
 0x269   : > { %795 = vperm.xlu1 %2790, %v3634_v14  }
 0x26b   : > { %v1478_v20 = vpop.xlane.xlu1 %1477 }
 0x26c   : > { %v3780_v18 = vmax.f32 %v3768_v5, %v1478_v20 }
 0x26d   : > { %799 = vperm.xlu1 %2790, %v3640_v19  }
 0x26e   : > { %2130 = vst.msk [vmem:[#allocation2 + $0x50] sm:$0xff] %vm283_vm0, %v3780_v18 }
 0x26f   : > { %v928_v51 = vpop.permute.xlu1 %927 }
 0x270   : > { %v986_v36 = vmul.f32 %v3296_v3, %v928_v51  ;;  %v987_v48 = vmul.f32 %v3298_v4, %v928_v51  ;;  %v3823_v51 = vld [vmem:[#allocation2 + $0x48] sm:$0xff] }
 0x271   : > { %787 = vperm.xlu1 %2790, %v3699_v56   ;;  %4899 = vst [vmem:[#allocation53_spill] sm:$0xff] %v3823_v51 }
 0x272   : > { %v1018_v20 = vadd.f32 %v986_v36, %v744_v52  ;;  %v1019_v28 = vadd.f32 %v987_v48, %v745_v16  ;;  %v4896_v36 = vmov 0  }
 0x274   : > { %v3795_v45 = vadd.f32 %v1260_v24, %v1018_v20  ;;  %v3797_v15 = vadd.f32 %v1261_v38, %v1019_v28  ;;  %v936_v24 = vpop.permute.xlu1 %935 }
 0x275   : > { %779 = vperm.xlu1 %2790, %v3793_v42  }
 0x276   : > { %4894 = vst [vmem:[#allocation49_spill] sm:$0xff] %v3795_v45  ;;  %4895 = vst [vmem:[#allocation50_spill] sm:$0xff] %v3797_v15  ;;  %v1479_v43 = vmax.f32 %v3795_v45, %v3797_v15  ;;  %v3842_v15 = vld [vmem:[#allocation2 + $0x60] sm:$0xff] }
 0x277   : > { %4906 = vst [vmem:[#allocation60_spill] sm:$0xff] %v3842_v15 }
 0x278   : > { %1480 = vmax.xlane.f32.xlu0 %v1479_v43  ;;  %v940_v28 = vpop.permute.xlu1 %939 }
 0x279   : > { %783 = vperm.xlu1 %2790, %v3805_v62  }
 0x27c   : > { %v3819_v11 = vpop.permute.xlu1 %1085 }
 0x27d   : > { %2791 = vset.pattern.permute.xlu1 %v4875_v53  ;;  %4897 = vst [vmem:[#allocation51_spill] sm:$0xff] %v3819_v11 }
 0x27e   : > { %1053 = vperm.xlu1 %2791, %v3793_v42  }
 0x280   : > { %v3821_v34 = vpop.permute.xlu1 %1089 }
 0x281   : > { %4898 = vst [vmem:[#allocation52_spill] sm:$0xff] %v3821_v34 }
 0x282   : > { %1057 = vperm.xlu1 %2791, %v3805_v62  }
 0x284   : > { %v3825_v16 = vpop.permute.xlu1 %1081 }
 0x285   : > { %4900 = vst [vmem:[#allocation54_spill] sm:$0xff] %v3825_v16 }
 0x286   : > { %2792 = vset.pattern.permute.xlu1 %v4884_v21 }
 0x287   : > { %1327 = vperm.xlu1 %2792, %v3793_v42  }
 0x288   : > { %v3832_v48 = vpop.permute.xlu1 %1069 }
 0x289   : > { %4901 = vst [vmem:[#allocation55_spill] sm:$0xff] %v3832_v48 }
 0x28b   : > { %1331 = vperm.xlu1 %2792, %v3805_v62  }
 0x28c   : > { %v3834_v38 = vpop.permute.xlu1 %1073 }
 0x28d   : > { %4902 = vst [vmem:[#allocation56_spill] sm:$0xff] %v3834_v38 }
 0x28e   : > { %665 = vperm.xlu0 %2785, %v3237_v27  }
 0x28f   : > { %2793 = vset.pattern.permute.xlu1 %v4896_v36 }
 0x292   : > { %791 = vperm.xlu0 %2785, %v3708_v31  }
 0x296   : > { %2788 = vset.pattern.permute.xlu0 %v4884_v21 }
 0x297   : > { %1209 = vperm.xlu0 %2788, %v3488_v41   ;;  %v3836_v41 = vpop.permute.xlu1 %1061 }
 0x298   : > { %4903 = vst [vmem:[#allocation57_spill] sm:$0xff] %v3836_v41 }
 0x29b   : > { %v3838_v20 = vpop.permute.xlu1 %1065 }
 0x29c   : > { %4904 = vst [vmem:[#allocation58_spill] sm:$0xff] %v3838_v20  ;;  %v476_v20 = vmul.f32 %v3284_v60, %v3518_v39 }
 0x29f   : > { %v3840_v43 = vpop.permute.xlu1 %1339 }
 0x2a0   : > { %4905 = vst [vmem:[#allocation59_spill] sm:$0xff] %v3840_v43 }
 0x2a6   : > { %v1475_v52 = vpop.xlane.xlu0 %1474 }
 0x2a7   : > { %v3828_v27 = vmax.f32 %v3823_v51, %v1475_v52  ;;  %v3849_v52 = vld [vmem:[#allocation2 + $0x58] sm:$0xff] }
 0x2a8   : > { %4907 = vst [vmem:[#allocation61_spill] sm:$0xff] %v3849_v52 }
 0x2a9   : > { %2129 = vst.msk [vmem:[#allocation2 + $0x48] sm:$0xff] %vm283_vm0, %v3828_v27 }
 0x2c9   : > { %v1484_v45 = vpop.xlane.xlu1 %1483 }
 0x2ca   : > { %v3845_v16 = vmax.f32 %v3842_v15, %v1484_v45  ;;  %v477_v45 = vmul.f32 %v3292_v0, %v3518_v39  ;;  %v992_v39 = vmul.f32 %v3296_v3, %v940_v28  ;;  %v4910_v15 = vld [vmem:[#allocation12_spill] sm:$0xff] }
 0x2cb   : > { %v994_v60 = vmul.f32 %v3296_v3, %v4910_v15  ;;  %v995_v2 = vmul.f32 %v3298_v4, %v4910_v15 }
 0x2cc   : > { %2132 = vst.msk [vmem:[#allocation2 + $0x60] sm:$0xff] %vm283_vm0, %v3845_v16 }
 0x2cd   : > { %v662_v57 = vpop.permute.xlu1 %661 }
 0x2ce   : > { %v716_v30 = vmul.f32 %v3280_v58, %v662_v57  ;;  %v717_v44 = vmul.f32 %v3282_v59, %v662_v57 }
 0x2d0   : > { %v749_v34 = vadd.f32 %v717_v44, %v475_v25 }
 0x2d1   : > { %v670_v43 = vpop.permute.xlu1 %669 }
 0x2d2   : > { %v720_v51 = vmul.f32 %v3280_v58, %v670_v43  ;;  %v721_v12 = vmul.f32 %v3282_v59, %v670_v43  ;;  %v748_v43 = vadd.f32 %v716_v30, %v474_v23 }
 0x301   : > { %v1481_v48 = vpop.xlane.xlu0 %1480 }
 0x302   : > { %v3852_v38 = vmax.f32 %v3849_v52, %v1481_v48  ;;  %v993_v52 = vmul.f32 %v3298_v4, %v940_v28 }
 0x304   : > { %2131 = vst.msk [vmem:[#allocation2 + $0x58] sm:$0xff] %vm283_vm0, %v3852_v38 }
 0x309   : > { %v666_v41 = vpop.permute.xlu0 %665 }
 0x30a   : > { %v718_v54 = vmul.f32 %v3280_v58, %v666_v41  ;;  %v719_v48 = vmul.f32 %v3282_v59, %v666_v41  ;;  %v479_v41 = vmul.f32 %v3292_v0, %v3520_v35 }
 0x30c   : > { %v750_v6 = vadd.f32 %v718_v54, %v476_v20  ;;  %v751_v57 = vadd.f32 %v719_v48, %v477_v45  ;;  %v752_v54 = vadd.f32 %v720_v51, %v478_v50  ;;  %v753_v20 = vadd.f32 %v721_v12, %v479_v41 }
 0x30d   : > { %v3880_v26 = vpop.permute.xlu0 %791  ;;  %v990_v45 = vmul.f32 %v3296_v3, %v936_v24  ;;  %v991_v48 = vmul.f32 %v3298_v4, %v936_v24  ;;  %v1268_v24 = vmul.f32 %v3290_v63, %v3750_v8 }
 0x30e   : > { %v1024_v11 = vadd.f32 %v992_v39, %v750_v6  ;;  %v1025_v28 = vadd.f32 %v993_v52, %v751_v57  ;;  %v1026_v50 = vadd.f32 %v994_v60, %v752_v54 }
 0x30f   : > { %v1022_v30 = vadd.f32 %v990_v45, %v748_v43  ;;  %v1023_v12 = vadd.f32 %v991_v48, %v749_v34  ;;  %v607_v48 = vmul.f32 %v3586_v55, %v3292_v0 }
 0x310   : > { %v3884_v5 = vadd.f32 %v1266_v47, %v1024_v11  ;;  %v3886_v35 = vadd.f32 %v1267_v33, %v1025_v28  ;;  %v1027_v47 = vadd.f32 %v995_v2, %v753_v20  ;;  %v1269_v11 = vmul.f32 %v3294_v1, %v3750_v8  ;;  %v485_v8 = vld [vmem:[%s4750_s2 + $0x28] sm:$0xff]  ;;  %v1444_v20 = vld [vmem:[#allocation2 + $0x70] sm:$0xff] }
 0x311   : > { %v3906_v52 = vadd.f32 %v1268_v24, %v1026_v50  ;;  %v4917_v50 = vld [vmem:[#allocation48_spill] sm:$0xff] }
 0x312   : > { %4908 = vst [vmem:[#allocation62_spill] sm:$0xff] %v3884_v5  ;;  %4909 = vst [vmem:[#allocation63_spill] sm:$0xff] %v3886_v35  ;;  %v1210_v23 = vpop.permute.xlu0 %1209  ;;  %v1488_v25 = vmax.f32 %v3884_v5, %v3886_v35  ;;  %v3908_v39 = vadd.f32 %v1269_v11, %v1027_v47  ;;  %v1520_v47 = vsub.f32 %v4917_v50, %v3780_v18 }
 0x313   : > { %v1264_v6 = vmul.f32 %v3290_v63, %v1210_v23  ;;  %v1265_v44 = vmul.f32 %v3294_v1, %v1210_v23  ;;  %4913 = vst [vmem:[#allocation65_spill] sm:$0xff] %v3906_v52  ;;  %v4915_v23 = vld [vmem:[#allocation10_spill] sm:$0xff] }
 0x314   : > { %1489 = vmax.xlane.f32.xlu1 %v1488_v25  ;;  %4914 = vst [vmem:[#allocation66_spill] sm:$0xff] %v3908_v39  ;;  %v1491_v60 = vmax.f32 %v3906_v52, %v3908_v39  ;;  %v606_v25 = vmul.f32 %v3586_v55, %v4915_v23 }
 0x315   : > { %v3900_v15 = vadd.f32 %v1264_v6, %v1022_v30  ;;  %v3902_v51 = vadd.f32 %v1265_v44, %v1023_v12  ;;  %v4916_v12 = vld [vmem:[#allocation60_spill] sm:$0xff] }
 0x316   : > { %v1522_v6 = vsub.f32 %v4916_v12, %v3845_v16  ;;  %v1445_v12 = vld [vmem:[#allocation2 + $0x78] sm:$0xff] }
 0x317   : > { %4911 = vst [vmem:[#allocation12_spill] sm:$0xff] %v3900_v15  ;;  %4912 = vst [vmem:[#allocation64_spill] sm:$0xff] %v3902_v51  ;;  %v1485_v34 = vmax.f32 %v3900_v15, %v3902_v51 }
 0x319   : > { %1486 = vmax.xlane.f32.xlu0 %v1485_v34  ;;  %v1443_v34 = vld [vmem:[#allocation2 + $0x68] sm:$0xff] }
 0x31d   : > { %1492 = vmax.xlane.f32.xlu0 %v1491_v60  ;;  %v4918_v60 = vld [vmem:[#allocation51_spill] sm:$0xff] }
 0x325   : > { %568 = vperm.xlu1 %2793, %v3621_v32   ;;  %v484_v32 = vld [vmem:[%s4750_s2 + $0x20] sm:$0xff] }
 0x329   : > { %558 = vperm.xlu1 %2793, %v3628_v13  }
 0x32d   : > { %548 = vperm.xlu1 %2793, %v3634_v14   ;;  %v482_v14 = vld [vmem:[%s4750_s2 + $0x10] sm:$0xff] }
 0x331   : > { %543 = vperm.xlu1 %2793, %v3708_v31  }
 0x333   : > { %1355 = vperm.xlu0 %2788, %v3681_v17  }
 0x335   : > { %533 = vperm.xlu1 %2793, %v3805_v62   ;;  %v481_v62 = vld [vmem:[%s4750_s2 + $0x8] sm:$0xff] }
 0x337   : > { %1335 = vperm.xlu0 %2788, %v3699_v56  }
 0x339   : > { %523 = vperm.xlu1 %2793, %v485_v8  }
 0x33b   : > { %1319 = vperm.xlu0 %2788, %v484_v32  }
 0x33d   : > { %2794 = vset.pattern.permute.xlu1 %v4863_v29 }
 0x33e   : > { %771 = vperm.xlu1 %2794, %v484_v32  }
 0x33f   : > { %2796 = vset.pattern.permute.xlu0 %v4875_v53 }
 0x340   : > { %1077 = vperm.xlu0 %2796, %v3628_v13   ;;  %v3938_v13 = vpop.permute.xlu1 %811 }
 0x342   : > { %2795 = vset.pattern.permute.xlu1 %v4875_v53 }
 0x343   : > { %1045 = vperm.xlu1 %2795, %v484_v32  }
 0x344   : > { %1037 = vperm.xlu0 %2796, %v482_v14   ;;  %v816_v31 = vpop.permute.xlu1 %815 }
 0x345   : > { %v848_v45 = vmul.f32 %v816_v31, %v3280_v58 }
 0x347   : > { %1049 = vperm.xlu1 %2795, %v485_v8   ;;  %v880_v24 = vadd.f32 %v848_v45, %v606_v25  ;;  %v1550_v45 = vmul.f32 1.442695, %v1522_v6  ;;  %v4921_v6 = vld [vmem:[#allocation44_spill] sm:$0xff] }
 0x348   : > { %2800 = vset.pattern.permute.xlu0 %v4896_v36 }
 0x349   : > { %563 = vperm.xlu0 %2800, %v3681_v17   ;;  %v483_v17 = vld [vmem:[%s4750_s2 + $0x18] sm:$0xff] }
 0x34b   : > { %2797 = vset.pattern.permute.xlu1 %v4884_v21 }
 0x34c   : > { %1323 = vperm.xlu1 %2797, %v485_v8  }
 0x34d   : > { %553 = vperm.xlu0 %2800, %v3640_v19   ;;  %v480_v19 = vld [vmem:[%s4750_s2] sm:$0xff] }
 0x350   : > { %2798 = vset.pattern.permute.xlu1 %v4896_v36 }
 0x351   : > { %508 = vperm.xlu1 %2798, %v482_v14   ;;  %538 = vperm.xlu0 %2800, %v3699_v56   ;;  %v3949_v56 = vpop.permute.xlu1 %803 }
 0x355   : > { %2799 = vset.pattern.permute.xlu1 %v4863_v29  ;;  %528 = vperm.xlu0 %2800, %v3793_v42   ;;  %v3952_v42 = vpop.permute.xlu1 %807 }
 0x356   : > { %763 = vperm.xlu1 %2799, %v482_v14  }
 0x359   : > { %518 = vperm.xlu0 %2800, %v484_v32   ;;  %v3960_v57 = vpop.permute.xlu1 %795  ;;  %v4919_v32 = vld [vmem:[#allocation52_spill] sm:$0xff] }
 0x35a   : > { %767 = vperm.xlu1 %2799, %v483_v17   ;;  %v1122_v55 = vmul.f32 %v4919_v32, %v3296_v3 }
 0x35c   : > { %v1154_v50 = vadd.f32 %v1122_v55, %v880_v24  ;;  %v4922_v55 = vld [vmem:[#allocation40_spill] sm:$0xff] }
 0x35d   : > { %513 = vperm.xlu0 %2800, %v483_v17   ;;  %v3964_v41 = vpop.permute.xlu1 %799 }
 0x35e   : > { %2801 = vset.pattern.permute.xlu1 %v4875_v53 }
 0x35f   : > { %1041 = vperm.xlu1 %2801, %v483_v17  }
 0x361   : > { %498 = vperm.xlu0 %2800, %v480_v19   ;;  %v3967_v33 = vpop.permute.xlu1 %787 }
 0x363   : > { %2802 = vset.pattern.permute.xlu1 %v4884_v21 }
 0x364   : > { %1311 = vperm.xlu1 %2802, %v482_v14   ;;  %v1123_v14 = vmul.f32 %v4919_v32, %v3298_v4  ;;  %v4920_v32 = vld [vmem:[#allocation43_spill] sm:$0xff] }
 0x365   : > { %2804 = vset.pattern.permute.xlu0 %v4863_v29  ;;  %v3973_v43 = vpop.permute.xlu1 %779 }
 0x366   : > { %775 = vperm.xlu0 %2804, %v485_v8   ;;  %v1120_v8 = vmul.f32 %v4918_v60, %v3296_v3 }
 0x368   : > { %2803 = vset.pattern.permute.xlu1 %v4896_v36 }
 0x369   : > { %1560 = vperm.xlu1 %2803, %v3525_v49   ;;  %v3976_v28 = vpop.permute.xlu1 %783 }
 0x36a   : > { %759 = vperm.xlu0 %2804, %v481_v62  }
 0x36d   : > { %1565 = vperm.xlu1 %2803, %v3534_v9  }
 0x36e   : > { %2806 = vset.pattern.permute.xlu0 %v4884_v21 }
 0x36f   : > { %1315 = vperm.xlu0 %2806, %v483_v17  }
 0x371   : > { %503 = vperm.xlu1 %2803, %v481_v62  }
 0x373   : > { %1303 = vperm.xlu0 %2806, %v480_v19  }
 0x375   : > { %2805 = vset.pattern.permute.xlu1 %v4863_v29  ;;  %v3980_v29 = vpop.permute.xlu1 %1053 }
 0x376   : > { %755 = vperm.xlu1 %2805, %v480_v19  }
 0x377   : > { %2810 = vset.pattern.permute.xlu0 %v4896_v36 }
 0x378   : > { %1575 = vperm.xlu0 %2810, %v3551_v22  }
 0x37a   : > { %2807 = vset.pattern.permute.xlu1 %v4875_v53  ;;  %v3985_v53 = vpop.permute.xlu1 %1057 }
 0x37b   : > { %1029 = vperm.xlu1 %2807, %v480_v19  }
 0x37c   : > { %1590 = vperm.xlu0 %2810, %v3591_v40  }
 0x37e   : > { %v3989_v54 = vpop.permute.xlu1 %1327 }
 0x37f   : > { %1033 = vperm.xlu1 %2807, %v481_v62  }
 0x380   : > { %1600 = vperm.xlu0 %2810, %v3702_v10  }
 0x383   : > { %2808 = vset.pattern.permute.xlu1 %v4884_v21  ;;  %v3992_v21 = vpop.permute.xlu1 %1331 }
 0x384   : > { %1307 = vperm.xlu1 %2808, %v481_v62   ;;  %1610 = vperm.xlu0 %2810, %v3780_v18   ;;  %v847_v18 = vmul.f32 %v3938_v13, %v3282_v59 }
 0x388   : > { %2809 = vset.pattern.permute.xlu1 %v4896_v36  ;;  %1620 = vperm.xlu0 %2810, %v3845_v16   ;;  %v849_v36 = vmul.f32 %v816_v31, %v3282_v59  ;;  %v846_v16 = vmul.f32 %v3938_v13, %v3280_v58  ;;  %v1394_v13 = vmul.f32 %v4920_v32, %v3290_v63 }
 0x389   : > { %1570 = vperm.xlu1 %2809, %v3537_v7  }
 0x38a   : > { %v881_v44 = vadd.f32 %v849_v36, %v607_v48 }
 0x38d   : > { %1580 = vperm.xlu1 %2809, %v3548_v61  }
 0x391   : > { %1585 = vperm.xlu1 %2809, %v3560_v37  }
 0x395   : > { %1595 = vperm.xlu1 %2809, %v3673_v46  }
 0x399   : > { %1605 = vperm.xlu1 %2809, %v3828_v27  }
 0x39d   : > { %1615 = vperm.xlu1 %2809, %v3852_v38   ;;  %v1490_v2 = vpop.xlane.xlu1 %1489 }
 0x39e   : > { %v1508_v30 = vmax.f32 %v1444_v20, %v1490_v2  ;;  %v1155_v2 = vadd.f32 %v1123_v14, %v881_v44  ;;  %v1397_v44 = vmul.f32 %v4921_v6, %v3294_v1 }
 0x3a0   : > { %v1524_v11 = vsub.f32 %v1444_v20, %v1508_v30  ;;  %2134 = vst.msk [vmem:[#allocation2 + $0x70] sm:$0xff] %vm283_vm0, %v1508_v30  ;;  %1630 = vperm.xlu0 %2810, %v1508_v30   ;;  %v1121_v20 = vmul.f32 %v4918_v60, %v3298_v4  ;;  %v1396_v60 = vmul.f32 %v4921_v6, %v3290_v63 }
 0x3a1   : > { %v569_v17 = vpop.permute.xlu1 %568 }
 0x3a2   : > { %v1554_v31 = vmul.f32 1.442695, %v1524_v11  ;;  %v604_v19 = vmul.f32 %v569_v17, %v4915_v23  ;;  %v605_v62 = vmul.f32 %v569_v17, %v3292_v0  ;;  %v1487_v36 = vpop.xlane.xlu0 %1486  ;;  %v1395_v11 = vmul.f32 %v4920_v32, %v3294_v1 }
 0x3a3   : > { %v1507_v48 = vmax.f32 %v1443_v34, %v1487_v36  ;;  %v1429_v36 = vadd.f32 %v1397_v44, %v1155_v2  ;;  %v1428_v39 = vadd.f32 %v1396_v60, %v1154_v50 }
 0x3a4   : > { %2811 = vpow2.f32 %v1554_v31  ;;  %v878_v25 = vadd.f32 %v846_v16, %v604_v19  ;;  %v879_v30 = vadd.f32 %v847_v18, %v605_v62  ;;  %v1518_v18 = vsub.f32 %v4922_v55, %v3702_v10 }
 0x3a5   : > { %2133 = vst.msk [vmem:[#allocation2 + $0x68] sm:$0xff] %vm283_vm0, %v1507_v48  ;;  %v4026_v17 = vpop.permute.xlu1 %558  ;;  %1625 = vperm.xlu1 %2809, %v1507_v48   ;;  %v1546_v31 = vmul.f32 1.442695, %v1520_v47  ;;  %2813 = vpow2.f32 %v1550_v45  ;;  %v1523_v52 = vsub.f32 %v1443_v34, %v1507_v48  ;;  %v4924_v45 = vld [vmem:[#allocation61_spill] sm:$0xff] }
 0x3a6   : > { %v1493_v14 = vpop.xlane.xlu0 %1492  ;;  %v1153_v16 = vadd.f32 %v1121_v20, %v879_v30  ;;  %v1152_v24 = vadd.f32 %v1120_v8, %v878_v25  ;;  %v4923_v25 = vld [vmem:[#allocation35_spill] sm:$0xff]  ;;  %v1542_v47 = vmul.f32 1.442695, %v1518_v18  ;;  %v1521_v2 = vsub.f32 %v4924_v45, %v3852_v38 }
 0x3a7   : > { %v1509_v19 = vmax.f32 %v1445_v12, %v1493_v14  ;;  %v1516_v10 = vsub.f32 %v4923_v25, %v3591_v40  ;;  %2815 = vpow2.f32 %v1546_v31  ;;  %v1552_v30 = vmul.f32 1.442695, %v1523_v52  ;;  %v4927_v40 = vld [vmem:[#allocation53_spill] sm:$0xff]  ;;  %v4928_v52 = vld [vmem:[#allocation27_spill] sm:$0xff] }
 0x3a8   : > { %v1427_v62 = vadd.f32 %v1395_v11, %v1153_v16  ;;  %v1426_v32 = vadd.f32 %v1394_v13, %v1152_v24  ;;  %v1519_v13 = vsub.f32 %v4927_v40, %v3828_v27  ;;  %v1548_v11 = vmul.f32 1.442695, %v1521_v2  ;;  %v4931_v24 = vld [vmem:[#allocation29_spill] sm:$0xff]  ;;  %v4932_v18 = vld [vmem:[#allocation39_spill] sm:$0xff] }
 0x3a9   : > { %v1525_v15 = vsub.f32 %v1445_v12, %v1509_v19  ;;  %2135 = vst.msk [vmem:[#allocation2 + $0x78] sm:$0xff] %vm283_vm0, %v1509_v19  ;;  %v4035_v51 = vpop.permute.xlu1 %548  ;;  %1635 = vperm.xlu1 %2809, %v1509_v19   ;;  %v4925_v12 = vld [vmem:[#allocation30_spill] sm:$0xff]  ;;  %v1510_v60 = vsub.f32 %v4928_v52, %v3525_v49  ;;  %v1512_v55 = vsub.f32 %v4931_v24, %v3537_v7  ;;  %v4934_v7 = vld [vmem:[#allocation32_spill] sm:$0xff] }
 0x3aa   : > { %v1877_v6 = vpack.c.bf16 %v1429_v36, %v1427_v62  ;;  %v1876_v20 = vpack.c.bf16 %v1428_v39, %v1426_v32  ;;  %v1514_v39 = vsub.f32 %v4925_v12, %v3548_v61  ;;  %v4929_v61 = vld [vmem:[#allocation28_spill] sm:$0xff]  ;;  %v1517_v31 = vsub.f32 %v4932_v18, %v3673_v46  ;;  %v4933_v36 = vld [vmem:[#allocation31_spill] sm:$0xff] }
 0x3ab   : > { %v1556_v8 = vmul.f32 1.442695, %v1525_v15  ;;  %v1538_v15 = vmul.f32 1.442695, %v1516_v10  ;;  %v1511_v14 = vsub.f32 %v4929_v61, %v3534_v9  ;;  %v1544_v19 = vmul.f32 1.442695, %v1519_v13 }
 0x3ac   : > { %1878 = vmatprep.subr.bf16.mxu0 %v1877_v6  ;;  %v1534_v27 = vmul.f32 1.442695, %v1514_v39  ;;  %v1526_v62 = vmul.f32 1.442695, %v1510_v60  ;;  %v1513_v32 = vsub.f32 %v4933_v36, %v3551_v22  ;;  %v1540_v46 = vmul.f32 1.442695, %v1517_v31 }
 0x3ad   : > { %2817 = vpow2.f32 %v1556_v8  ;;  %1879 = vmatpush1.bf16.xpose.msra.mxu0 %v1876_v20  ;;  %v4041_v34 = vpop.permute.xlu1 %543  ;;  %v1528_v6 = vmul.f32 1.442695, %v1511_v14  ;;  %v1515_v20 = vsub.f32 %v4934_v7, %v3560_v37  ;;  %v1530_v8 = vmul.f32 1.442695, %v1512_v55  ;;  %v4943_v14 = vld [vmem:[#allocation47_spill] sm:$0xff] }
 0x3ae   : > { %v4043_v48 = vpop.permute.xlu0 %1355  ;;  %2819 = vpow2.f32 %v1542_v47  ;;  %v1532_v22 = vmul.f32 1.442695, %v1513_v32  ;;  %v4113_v24 = vmul.f32 %v4943_v14, %v3290_v63  ;;  %v4117_v55 = vmul.f32 %v4943_v14, %v3294_v1 }
 0x3af   : > { %2821 = vpow2.f32 %v1552_v30  ;;  %v1536_v45 = vmul.f32 1.442695, %v1515_v20  ;;  %v600_v32 = vmul.f32 %v4026_v17, %v4915_v23  ;;  %v597_v7 = vmul.f32 %v4035_v51, %v3292_v0 }
 0x3b0   : > { %2823 = vpow2.f32 %v1538_v15  ;;  %v4940_v15 = vld [vmem:[#allocation45_spill] sm:$0xff]  ;;  %v595_v5 = vmul.f32 %v4041_v34, %v3292_v0 }
 0x3b1   : > { %v4047_v50 = vpop.eup %2811  ;;  %v4051_v38 = vpop.permute.xlu1 %533  ;;  %2825 = vpow2.f32 %v1548_v11  ;;  %v4095_v40 = vmul.f32 %v4940_v15, %v3290_v63  ;;  %v4099_v13 = vmul.f32 %v4940_v15, %v3294_v1  ;;  %v4941_v11 = vld [vmem:[#allocation46_spill] sm:$0xff]  ;;  %v844_v15 = vmul.f32 %v3952_v42, %v3280_v58 }
 0x3b2   : > { %4926 = vst [vmem:[#allocation10_spill] sm:$0xff] %v4047_v50  ;;  %1822 = vperm.xlu1 %2809, %v4047_v50   ;;  %v4056_v44 = vpop.permute.xlu0 %1335  ;;  %v4060_v16 = vpop.eup %2813  ;;  %2827 = vpow2.f32 %v1534_v27  ;;  %v4103_v52 = vmul.f32 %v4941_v11, %v3290_v63  ;;  %v4107_v60 = vmul.f32 %v4941_v11, %v3294_v1  ;;  %v4944_v27 = vld [vmem:[#allocation54_spill] sm:$0xff]  ;;  %v839_v11 = vmul.f32 %v3960_v57, %v3282_v59 }
 0x3b3   : > { %4930 = vst [vmem:[#allocation60_spill] sm:$0xff] %v4060_v16  ;;  %2829 = vpow2.f32 %v1544_v19  ;;  %v1118_v18 = vmul.f32 %v4944_v27, %v3296_v3  ;;  %v1119_v31 = vmul.f32 %v4944_v27, %v3298_v4 }
 0x3b4   : > { %v4075_v25 = vpop.eup %2815  ;;  %2831 = vpow2.f32 %v1526_v62  ;;  %v4946_v62 = vld [vmem:[#allocation55_spill] sm:$0xff]  ;;  %v871_v50 = vadd.f32 %v839_v11, %v597_v7 }
 0x3b5   : > { %v4066_v49 = vpop.permute.xlu1 %523  ;;  %4935 = vst [vmem:[#allocation48_spill] sm:$0xff] %v4075_v25  ;;  %2833 = vpow2.f32 %v1528_v6  ;;  %v4127_v36 = vmul.f32 %v4946_v62, %v3296_v3  ;;  %v601_v6 = vmul.f32 %v4026_v17, %v3292_v0  ;;  %v843_v17 = vmul.f32 %v3949_v56, %v3282_v59 }
 0x3b6   : > { %1812 = vperm.xlu1 %2809, %v4060_v16   ;;  %v4071_v9 = vpop.permute.xlu0 %1319  ;;  %2835 = vpow2.f32 %v1530_v8  ;;  %v1113_v8 = vmul.f32 %v4946_v62, %v3298_v4 }
 0x3b7   : > { %2837 = vpow2.f32 %v1540_v46  ;;  %v4948_v46 = vld [vmem:[#allocation56_spill] sm:$0xff] }
 0x3b8   : > { %2839 = vpow2.f32 %v1532_v22  ;;  %v4142_v22 = vmul.f32 %v4948_v46, %v3296_v3 }
 0x3b9   : > { %v4077_v10 = vpop.permute.xlu1 %771  ;;  %2841 = vpow2.f32 %v1536_v45  ;;  %v842_v45 = vmul.f32 %v3949_v56, %v3280_v58  ;;  %v840_v56 = vmul.f32 %v3964_v41, %v3280_v58 }
 0x3ba   : > { %v4079_v47 = vpop.eup %2817  ;;  %1802 = vperm.xlu1 %2809, %v4075_v25  }
 0x3bb   : > { %4936 = vst [vmem:[#allocation51_spill] sm:$0xff] %v4079_v47  ;;  %1827 = vperm.xlu0 %2810, %v4079_v47   ;;  %v1078_v2 = vpop.permute.xlu0 %1077  ;;  %v4083_v37 = vpop.eup %2819  ;;  %v841_v47 = vmul.f32 %v3964_v41, %v3282_v59 }
 0x3bc   : > { %4937 = vst [vmem:[#allocation52_spill] sm:$0xff] %v4083_v37  ;;  %v4085_v30 = vpop.eup %2821  ;;  %v1116_v14 = vmul.f32 %v1078_v2, %v3296_v3  ;;  %v1117_v27 = vmul.f32 %v1078_v2, %v3298_v4  ;;  %v875_v2 = vadd.f32 %v843_v17, %v601_v6  ;;  %v1393_v6 = vmul.f32 %v4043_v48, %v3294_v1 }
 0x3bd   : > { %4938 = vst [vmem:[#allocation43_spill] sm:$0xff] %v4085_v30  ;;  %v4109_v61 = vpop.eup %2823 }
 0x3be   : > { %v4087_v12 = vpop.permute.xlu1 %1045  ;;  %1792 = vperm.xlu1 %2809, %v4083_v37   ;;  %4942 = vst [vmem:[#allocation40_spill] sm:$0xff] %v4109_v61  ;;  %v4123_v19 = vpop.eup %2825  ;;  %v845_v37 = vmul.f32 %v3952_v42, %v3282_v59  ;;  %v596_v42 = vmul.f32 %v4035_v51, %v4915_v23 }
 0x3bf   : > { %1817 = vperm.xlu0 %2810, %v4085_v30   ;;  %v4091_v39 = vpop.permute.xlu0 %1037  ;;  %4945 = vst [vmem:[#allocation35_spill] sm:$0xff] %v4123_v19 }
 0x3c0   : > { %4939 = vst [vmem:[#allocation44_spill] sm:$0xff] %v4091_v39 }
 0x3c2   : > { %v4135_v20 = vpop.permute.xlu1 %1049  ;;  %1782 = vperm.xlu1 %2809, %v4109_v61   ;;  %v4155_v61 = vpop.eup %2827 }
 0x3c3   : > { %4947 = vst [vmem:[#allocation61_spill] sm:$0xff] %v4135_v20  ;;  %1807 = vperm.xlu0 %2810, %v4123_v19   ;;  %4949 = vst [vmem:[#allocation30_spill] sm:$0xff] %v4155_v61  ;;  %v4163_v30 = vpop.eup %2829  ;;  %v874_v19 = vadd.f32 %v842_v45, %v600_v32  ;;  %v1392_v32 = vmul.f32 %v4043_v48, %v3290_v63  ;;  %v1149_v45 = vadd.f32 %v1117_v27, %v875_v2 }
 0x3c4   : > { %v564_v62 = vpop.permute.xlu0 %563  ;;  %4950 = vst [vmem:[#allocation53_spill] sm:$0xff] %v4163_v30  ;;  %v4168_v35 = vpop.eup %2831  ;;  %v837_v48 = vmul.f32 %v3880_v26, %v3282_v59 }
 0x3c5   : > { %v602_v25 = vmul.f32 %v564_v62, %v4915_v23  ;;  %v603_v16 = vmul.f32 %v564_v62, %v3292_v0  ;;  %v4177_v41 = vpop.eup %2833  ;;  %v1148_v7 = vadd.f32 %v1116_v14, %v874_v19  ;;  %v1145_v19 = vadd.f32 %v1113_v8, %v871_v50 }
 0x3c6   : > { %1772 = vperm.xlu1 %2809, %v4155_v61   ;;  %v4183_v17 = vpop.eup %2835  ;;  %v1115_v61 = vmul.f32 %v4948_v46, %v3298_v4  ;;  %v4952_v46 = vld [vmem:[#allocation57_spill] sm:$0xff]  ;;  %v1423_v50 = vadd.f32 %v4099_v13, %v1149_v45 }
 0x3c7   : > { %v876_v20 = vadd.f32 %v844_v15, %v602_v25  ;;  %v877_v62 = vadd.f32 %v845_v37, %v603_v16  ;;  %v4174_v39 = vpop.permute.xlu1 %1323  ;;  %1797 = vperm.xlu0 %2810, %v4163_v30   ;;  %4951 = vst [vmem:[#allocation27_spill] sm:$0xff] %v4183_v17  ;;  %v4187_v15 = vpop.eup %2837  ;;  %v838_v30 = vmul.f32 %v3960_v57, %v3280_v58 }
 0x3c8   : > { %v554_v51 = vpop.permute.xlu0 %553  ;;  %v1419_v45 = vadd.f32 %v4107_v60, %v1145_v19 }
 0x3c9   : > { %v1150_v11 = vadd.f32 %v1118_v18, %v876_v20  ;;  %v1151_v25 = vadd.f32 %v1119_v31, %v877_v62  ;;  %v598_v16 = vmul.f32 %v554_v51, %v4915_v23  ;;  %v599_v37 = vmul.f32 %v554_v51, %v3292_v0  ;;  %v4196_v18 = vpop.eup %2839 }
 0x3ca   : > { %1762 = vperm.xlu1 %2809, %v4183_v17   ;;  %v4199_v2 = vpop.eup %2841  ;;  %v1109_v62 = vmul.f32 %v4952_v46, %v3298_v4  ;;  %v870_v57 = vadd.f32 %v838_v30, %v596_v42  ;;  %v1422_v51 = vadd.f32 %v4095_v40, %v1148_v7 }
 0x3cb   : > { %v872_v31 = vadd.f32 %v840_v56, %v598_v16  ;;  %v873_v20 = vadd.f32 %v841_v47, %v599_v37  ;;  %1787 = vperm.xlu0 %2810, %v4187_v15   ;;  %v1425_v14 = vadd.f32 %v1393_v6, %v1151_v25  ;;  %v1424_v27 = vadd.f32 %v1392_v32, %v1150_v11  ;;  %v4953_v56 = vld [vmem:[#allocation58_spill] sm:$0xff]  ;;  %v4954_v16 = vld [vmem:[#allocation59_spill] sm:$0xff] }
 0x3cc   : > { %v4205_v8 = vpop.permute.xlu1 %508  ;;  %v539_v17 = vpop.permute.xlu0 %538  ;;  %v1111_v47 = vmul.f32 %v4953_v56, %v3298_v4  ;;  %v1385_v6 = vmul.f32 %v4954_v16, %v3294_v1  ;;  %v869_v32 = vadd.f32 %v837_v48, %v595_v5  ;;  %v835_v25 = vmul.f32 %v3967_v33, %v3282_v59 }
 0x3cd   : > { %v1147_v11 = vadd.f32 %v1115_v61, %v873_v20  ;;  %v593_v30 = vmul.f32 %v539_v17, %v3292_v0  ;;  %v1875_v40 = vpack.c.bf16 %v1425_v14, %v1423_v50  ;;  %v1874_v13 = vpack.c.bf16 %v1424_v27, %v1422_v51 }
 0x3ce   : > { %1752 = vperm.xlu1 %2809, %v4168_v35   ;;  %v1146_v42 = vadd.f32 %v4142_v22, %v872_v31  ;;  %v592_v7 = vmul.f32 %v539_v17, %v4915_v23  ;;  %v834_v61 = vmul.f32 %v3967_v33, %v3280_v58  ;;  %v831_v37 = vmul.f32 %v3973_v43, %v3282_v59 }
 0x3cf   : > { %1777 = vperm.xlu0 %2810, %v4199_v2   ;;  %v1421_v5 = vadd.f32 %v4117_v55, %v1147_v11  ;;  %v1144_v48 = vadd.f32 %v4127_v36, %v870_v57  ;;  %v867_v20 = vadd.f32 %v835_v25, %v593_v30  ;;  %1880 = vmatprep.subr.bf16.mxu0 %v1875_v40 }
 0x3d0   : > { %v529_v14 = vpop.permute.xlu0 %528  ;;  %v594_v22 = vmul.f32 %v4041_v34, %v4915_v23  ;;  %v1143_v17 = vadd.f32 %v1111_v47, %v869_v32  ;;  %1881 = vmatpush1.bf16.xpose.msra.mxu0 %v1874_v13  ;;  %v590_v33 = vmul.f32 %v4051_v38, %v4915_v23  ;;  %v591_v31 = vmul.f32 %v4051_v38, %v3292_v0 }
 0x3d1   : > { %v589_v60 = vmul.f32 %v529_v14, %v3292_v0  ;;  %v4228_v19 = vpop.permute.xlu1 %763  ;;  %v1873_v55 = vpack.c.bf16 %v1421_v5, %v1419_v45  ;;  %v1383_v36 = vmul.f32 %v4056_v44, %v3294_v1  ;;  %v1141_v27 = vadd.f32 %v1109_v62, %v867_v20 }
 0x3d2   : > { %v836_v34 = vmul.f32 %v3880_v26, %v3280_v58  ;;  %v866_v57 = vadd.f32 %v834_v61, %v592_v7  ;;  %v1420_v51 = vadd.f32 %v4113_v24, %v1146_v42  ;;  %v832_v50 = vmul.f32 %v3976_v28, %v3280_v58 }
 0x3d3   : > { %1767 = vperm.xlu0 %2810, %v4196_v18   ;;  %1882 = vmatprep.subr.bf16.mxu0 %v1873_v55  ;;  %v833_v47 = vmul.f32 %v3976_v28, %v3282_v59  ;;  %v863_v38 = vadd.f32 %v831_v37, %v589_v60  ;;  %v1415_v11 = vadd.f32 %v1383_v36, %v1141_v27 }
 0x3d4   : > { %v519_v32 = vpop.permute.xlu0 %518  ;;  %v1108_v62 = vmul.f32 %v4952_v46, %v3296_v3  ;;  %v868_v25 = vadd.f32 %v836_v34, %v594_v22  ;;  %v1418_v30 = vadd.f32 %v4103_v52, %v1144_v48  ;;  %v1105_v24 = vmul.f32 %v3980_v29, %v3298_v4 }
 0x3d5   : > { %v4246_v26 = vpop.permute.xlu1 %767  ;;  %v864_v40 = vadd.f32 %v832_v50, %v590_v33  ;;  %v865_v13 = vadd.f32 %v833_v47, %v591_v31  ;;  %v1417_v42 = vadd.f32 %v1385_v6, %v1143_v17  ;;  %v1110_v28 = vmul.f32 %v4953_v56, %v3296_v3 }
 0x3d6   : > { %v1140_v7 = vadd.f32 %v1108_v62, %v866_v57  ;;  %v588_v45 = vmul.f32 %v529_v14, %v4915_v23  ;;  %v1872_v46 = vpack.c.bf16 %v1420_v51, %v1418_v30  ;;  %v1106_v5 = vmul.f32 %v3985_v53, %v3296_v3 }
 0x3d7   : > { %1757 = vperm.xlu0 %2810, %v4177_v41   ;;  %v1107_v52 = vmul.f32 %v3985_v53, %v3298_v4  ;;  %v1137_v61 = vadd.f32 %v1105_v24, %v863_v38  ;;  %v1871_v48 = vpack.c.bf16 %v1417_v42, %v1415_v11  ;;  %v830_v6 = vmul.f32 %v3973_v43, %v3280_v58  ;;  %v4955_v42 = vld [vmem:[#allocation44_spill] sm:$0xff] }
 0x3d8   : > { %v4259_v37 = vpop.permute.xlu0 %513  ;;  %v1142_v56 = vadd.f32 %v1110_v28, %v868_v25  ;;  %v1382_v20 = vmul.f32 %v4056_v44, %v3290_v63  ;;  %1883 = vmatpush1.bf16.xpose.msra.mxu0 %v1872_v46  ;;  %v1384_v14 = vmul.f32 %v4954_v16, %v3290_v63  ;;  %v1379_v22 = vmul.f32 %v3989_v54, %v3294_v1 }
 0x3d9   : > { %v1138_v17 = vadd.f32 %v1106_v5, %v864_v40  ;;  %v1139_v53 = vadd.f32 %v1107_v52, %v865_v13  ;;  %1884 = vmatprep.subr.bf16.mxu0 %v1871_v48  ;;  %v1104_v55 = vmul.f32 %v3980_v29, %v3296_v3  ;;  %v1378_v43 = vmul.f32 %v3989_v54, %v3290_v63 }
 0x3da   : > { %v4269_v60 = vpop.permute.xlu1 %1041  ;;  %v862_v33 = vadd.f32 %v830_v6, %v588_v45  ;;  %v1414_v44 = vadd.f32 %v1382_v20, %v1140_v7  ;;  %v1380_v31 = vmul.f32 %v3992_v21, %v3290_v63  ;;  %v1381_v16 = vmul.f32 %v3992_v21, %v3294_v1  ;;  %v4956_v7 = vld [vmem:[#allocation61_spill] sm:$0xff] }
 0x3db   : > { %v585_v36 = vmul.f32 %v519_v32, %v3292_v0  ;;  %v1411_v34 = vadd.f32 %v1379_v22, %v1137_v61  ;;  %v586_v57 = vmul.f32 %v4066_v49, %v4915_v23  ;;  %v587_v29 = vmul.f32 %v4066_v49, %v3292_v0 }
 0x3dc   : > { %v4280_v27 = vpop.permute.xlu0 %498  ;;  %v4288_v54 = vmul.f32 %v4071_v9, %v3290_v63  ;;  %v1416_v51 = vadd.f32 %v1384_v14, %v1142_v56  ;;  %v1375_v50 = vmul.f32 %v4071_v9, %v3294_v1  ;;  %v827_v21 = vmul.f32 %v4077_v10, %v3282_v59 }
 0x3dd   : > { %v1413_v47 = vadd.f32 %v1381_v16, %v1139_v53  ;;  %v1412_v38 = vadd.f32 %v1380_v31, %v1138_v17  ;;  %v826_v11 = vmul.f32 %v4077_v10, %v3280_v58  ;;  %v1100_v62 = vmul.f32 %v4087_v12, %v3296_v3  ;;  %v4957_v31 = vld [vmem:[#allocation15_spill] sm:$0xff] }
 0x3de   : > { %v1136_v49 = vadd.f32 %v1104_v55, %v862_v33  ;;  %v1870_v30 = vpack.c.bf16 %v1416_v51, %v1414_v44  ;;  %v1101_v24 = vmul.f32 %v4087_v12, %v3298_v4  ;;  %v584_v9 = vmul.f32 %v519_v32, %v4915_v23 }
 0x3df   : > { %v4298_v25 = vpop.permute.xlu1 %1311  ;;  %v859_v40 = vadd.f32 %v827_v21, %v585_v36  ;;  %v1869_v13 = vpack.c.bf16 %v1413_v47, %v1411_v34  ;;  %v1097_v28 = vmul.f32 %v4955_v42, %v3298_v4  ;;  %v1102_v10 = vmul.f32 %v4956_v7, %v3296_v3  ;;  %v4958_v36 = vld [vmem:[#allocation16_spill] sm:$0xff] }
 0x3e0   : > { %v1103_v45 = vmul.f32 %v4956_v7, %v3298_v4  ;;  %v823_v46 = vmul.f32 %v4228_v19, %v3282_v59  ;;  %1885 = vmatpush1.bf16.xpose.msra.mxu0 %v1870_v30  ;;  %v1376_v12 = vmul.f32 %v4174_v39, %v3290_v63  ;;  %v583_v32 = vmul.f32 %v4259_v37, %v3292_v0 }
 0x3e1   : > { %v776_v5 = vpop.permute.xlu0 %775  ;;  %1886 = vmatprep.subr.bf16.mxu0 %v1869_v13  ;;  %v1377_v48 = vmul.f32 %v4174_v39, %v3294_v1  ;;  %v581_v6 = vmul.f32 %v4205_v8, %v3292_v0  ;;  %v825_v56 = vmul.f32 %v4246_v26, %v3282_v59  ;;  %v1410_v20 = vadd.f32 %v1378_v43, %v1136_v49 }
 0x3e2   : > { %v828_v52 = vmul.f32 %v776_v5, %v3280_v58  ;;  %v829_v61 = vmul.f32 %v776_v5, %v3282_v59  ;;  %v858_v14 = vadd.f32 %v826_v11, %v584_v9  ;;  %v1133_v22 = vadd.f32 %v1101_v24, %v859_v40 }
 0x3e3   : > { %v822_v33 = vmul.f32 %v4228_v19, %v3280_v58  ;;  %v855_v44 = vadd.f32 %v823_v46, %v581_v6  ;;  %v824_v51 = vmul.f32 %v4246_v26, %v3280_v58  ;;  %v857_v21 = vadd.f32 %v825_v56, %v583_v32  ;;  %v4959_v26 = vld [vmem:[#allocation17_spill] sm:$0xff]  ;;  %v4960_v46 = vld [vmem:[#allocation18_spill] sm:$0xff] }
 0x3e4   : > { %v860_v17 = vadd.f32 %v828_v52, %v586_v57  ;;  %v861_v53 = vadd.f32 %v829_v61, %v587_v29  ;;  %v1561_v55 = vpop.permute.xlu1 %1560  ;;  %v1099_v43 = vmul.f32 %v4269_v60, %v3298_v4  ;;  %v1868_v49 = vpack.c.bf16 %v1412_v38, %v1410_v20 }
 0x3e5   : > { %v1638_v16 = vsub.f32 %v4957_v31, %v1561_v55  ;;  %v1639_v39 = vsub.f32 %v4958_v36, %v1561_v55  ;;  %v4327_v34 = vpop.permute.xlu0 %759  ;;  %v1132_v19 = vadd.f32 %v1100_v62, %v858_v14  ;;  %v582_v30 = vmul.f32 %v4259_v37, %v4915_v23 }
 0x3e6   : > { %v1135_v57 = vadd.f32 %v1103_v45, %v861_v53  ;;  %v1134_v29 = vadd.f32 %v1102_v10, %v860_v17  ;;  %v1407_v9 = vadd.f32 %v1375_v50, %v1133_v22  ;;  %v1371_v13 = vmul.f32 %v4298_v25, %v3294_v1 }
 0x3e7   : > { %v1670_v47 = vmul.f32 1.442695, %v1638_v16  ;;  %v1672_v11 = vmul.f32 1.442695, %v1639_v39  ;;  %v1131_v10 = vadd.f32 %v1099_v43, %v857_v21  ;;  %v1129_v45 = vadd.f32 %v1097_v28, %v855_v44 }
 0x3e8   : > { %v1566_v24 = vpop.permute.xlu1 %1565  ;;  %v1409_v40 = vadd.f32 %v1377_v48, %v1135_v57  ;;  %1887 = vmatpush1.bf16.xpose.msra.mxu0 %v1868_v49  ;;  %v1408_v50 = vadd.f32 %v1376_v12, %v1134_v29  ;;  %v580_v61 = vmul.f32 %v4205_v8, %v4915_v23  ;;  %v856_v48 = vadd.f32 %v824_v51, %v582_v30 }
 0x3e9   : > { %2843 = vpow2.f32 %v1670_v47  ;;  %v1640_v7 = vsub.f32 %v4959_v26, %v1566_v24  ;;  %v1641_v5 = vsub.f32 %v4960_v46, %v1566_v24  ;;  %v1098_v6 = vmul.f32 %v4269_v60, %v3296_v3 }
 0x3ea   : > { %2845 = vpow2.f32 %v1672_v11  ;;  %v1316_v38 = vpop.permute.xlu0 %1315  ;;  %v1867_v62 = vpack.c.bf16 %v1409_v40, %v1407_v9  ;;  %v1403_v20 = vadd.f32 %v1371_v13, %v1129_v45  ;;  %v1406_v14 = vadd.f32 %v4288_v54, %v1132_v19 }
 0x3eb   : > { %v1674_v32 = vmul.f32 1.442695, %v1640_v7  ;;  %v1676_v52 = vmul.f32 1.442695, %v1641_v5  ;;  %v1373_v37 = vmul.f32 %v1316_v38, %v3294_v1  ;;  %v854_v22 = vadd.f32 %v822_v33, %v580_v61  ;;  %v4962_v61 = vld [vmem:[#allocation20_spill] sm:$0xff] }
 0x3ec   : > { %v504_v56 = vpop.permute.xlu1 %503  ;;  %1888 = vmatprep.subr.bf16.mxu0 %v1867_v62  ;;  %v1372_v17 = vmul.f32 %v1316_v38, %v3290_v63  ;;  %v1866_v53 = vpack.c.bf16 %v1408_v50, %v1406_v14  ;;  %v1096_v8 = vmul.f32 %v4955_v42, %v3296_v3  ;;  %v1130_v55 = vadd.f32 %v1098_v6, %v856_v48 }
 0x3ed   : > { %2847 = vpow2.f32 %v1674_v32  ;;  %v1405_v28 = vadd.f32 %v1373_v37, %v1131_v10  ;;  %v1370_v60 = vmul.f32 %v4298_v25, %v3290_v63  ;;  %v820_v25 = vmul.f32 %v4327_v34, %v3280_v58 }
 0x3ee   : > { %2849 = vpow2.f32 %v1676_v52  ;;  %v1128_v31 = vadd.f32 %v1096_v8, %v854_v22  ;;  %v1404_v16 = vadd.f32 %v1372_v17, %v1130_v55  ;;  %v1304_v33 = vpop.permute.xlu0 %1303  ;;  %v578_v57 = vmul.f32 %v504_v56, %v4915_v23  ;;  %v4963_v8 = vld [vmem:[#allocation13_spill] sm:$0xff] }
 0x3ef   : > { %v1865_v12 = vpack.c.bf16 %v1405_v28, %v1403_v20  ;;  %v577_v11 = vmul.f32 %v4280_v27, %v3292_v0  ;;  %v821_v49 = vmul.f32 %v4327_v34, %v3282_v59  ;;  %v579_v19 = vmul.f32 %v504_v56, %v3292_v0 }
 0x3f0   : > { %1889 = vmatpush1.bf16.xpose.msra.mxu0 %v1866_v53  ;;  %v1402_v36 = vadd.f32 %v1370_v60, %v1128_v31  ;;  %v576_v40 = vmul.f32 %v4280_v27, %v4915_v23  ;;  %v852_v10 = vadd.f32 %v820_v25, %v578_v57  ;;  %v1367_v0 = vmul.f32 %v1304_v33, %v3294_v1  ;;  %v4961_v27 = vld [vmem:[#allocation19_spill] sm:$0xff]  ;;  %v4964_v60 = vld [vmem:[#allocation14_spill] sm:$0xff] }
 0x3f1   : > { %v756_v44 = vpop.permute.xlu1 %755  ;;  %1890 = vmatprep.subr.bf16.mxu0 %v1865_v12  ;;  %v853_v34 = vadd.f32 %v821_v49, %v579_v19  ;;  %v1366_v23 = vmul.f32 %v1304_v33, %v3290_v63  ;;  %v4968_v19 = vld [vmem:[#allocation23_spill] sm:$0xff] }
 0x3f2   : > { %v1864_v21 = vpack.c.bf16 %v1404_v16, %v1402_v36  ;;  %v819_v43 = vmul.f32 %v756_v44, %v3282_v59  ;;  %v818_v29 = vmul.f32 %v756_v44, %v3280_v58  ;;  %v4965_v36 = vld [vmem:[#allocation21_spill] sm:$0xff] }
 0x3f3   : > { %v1576_v26 = vpop.permute.xlu0 %1575 }
 0x3f4   : > { %v851_v58 = vadd.f32 %v819_v43, %v577_v11  ;;  %v850_v59 = vadd.f32 %v818_v29, %v576_v40  ;;  %v1644_v62 = vsub.f32 %v4961_v27, %v1576_v26  ;;  %v1645_v48 = vsub.f32 %v4962_v61, %v1576_v26  ;;  %v4967_v11 = vld [vmem:[#allocation26_spill] sm:$0xff] }
 0x3f6   : > { %v4350_v54 = vpop.eup %2843  ;;  %v1030_v39 = vpop.permute.xlu1 %1029  ;;  %v1682_v14 = vmul.f32 1.442695, %v1644_v62  ;;  %v1684_v53 = vmul.f32 1.442695, %v1645_v48  ;;  %v4974_v62 = vld [vmem:[#allocation41_spill] sm:$0xff] }
 0x3f7   : > { %v2846_v51 = vpop.eup %2845  ;;  %v1093_v30 = vmul.f32 %v1030_v39, %v3298_v4  ;;  %v1092_v13 = vmul.f32 %v1030_v39, %v3296_v3  ;;  %v1591_v12 = vpop.permute.xlu0 %1590  ;;  %v4966_v39 = vld [vmem:[#allocation22_spill] sm:$0xff] }
 0x3f8   : > { %v4354_v42 = vadd.f32 %v2846_v51, %v4350_v54  ;;  %1891 = vmatpush1.bf16.xpose.msra.mxu0 %v1864_v21  ;;  %2851 = vpow2.f32 %v1682_v14  ;;  %v1651_v49 = vsub.f32 %v4967_v11, %v1591_v12 }
 0x3f9   : > { %v1125_v45 = vadd.f32 %v1093_v30, %v851_v58  ;;  %v1124_v32 = vadd.f32 %v1092_v13, %v850_v59  ;;  %2853 = vpow2.f32 %v1684_v53  ;;  %v4972_v59 = vld [vmem:[#allocation25_spill] sm:$0xff] }
 0x3fa   : > { %v2848_v47 = vpop.eup %2847  ;;  %v1034_v24 = vpop.permute.xlu1 %1033  ;;  %v1696_v26 = vmul.f32 1.442695, %v1651_v49 }
 0x3fb   : > { %v2850_v9 = vpop.eup %2849  ;;  %v1094_v7 = vmul.f32 %v1034_v24, %v3296_v3  ;;  %v1095_v46 = vmul.f32 %v1034_v24, %v3298_v4  ;;  %v1399_v6 = vadd.f32 %v1367_v0, %v1125_v45  ;;  %v1398_v28 = vadd.f32 %v1366_v23, %v1124_v32  ;;  %v4383_v21 = vpop.permute.xlu0 %1600  ;;  %v4969_v24 = vld [vmem:[#allocation24_spill] sm:$0xff]  ;;  %v4973_v23 = vld [vmem:[#allocation37_spill] sm:$0xff] }
 0x3fc   : > { %v1847_v5 = vpack.c.bf16 %v2850_v9, %v2846_v51  ;;  %v4372_v38 = vadd.f32 %v2850_v9, %v2848_v47  ;;  %v1846_v29 = vpack.c.bf16 %v2848_v47, %v4350_v54  ;;  %v4971_v54 = vld [vmem:[#allocation33_spill] sm:$0xff]  ;;  %v1655_v27 = vsub.f32 %v4973_v23, %v4383_v21  ;;  %v4985_v23 = vld [vmem:[#allocation42_spill] sm:$0xff] }
 0x3fd   : > { %v1126_v37 = vadd.f32 %v1094_v7, %v852_v10  ;;  %v1127_v3 = vadd.f32 %v1095_v46, %v853_v34  ;;  %v4970_v46 = vld [vmem:[#allocation34_spill] sm:$0xff]  ;;  %v1650_v34 = vsub.f32 %v4972_v59, %v1591_v12 }
 0x3fe   : > { %1910 = vmatprep.mubr.bf16.mxu0 %v1847_v5  ;;  %v1704_v14 = vmul.f32 1.442695, %v1655_v27 }
 0x3ff   : > { %v1308_v52 = vpop.permute.xlu1 %1307  ;;  %v4389_v7 = vpop.permute.xlu0 %1610 }
 0x400   : > { %v1368_v4 = vmul.f32 %v1308_v52, %v3290_v63  ;;  %v1369_v50 = vmul.f32 %v1308_v52, %v3294_v1 }
 0x402   : > { %v1400_v56 = vadd.f32 %v1368_v4, %v1126_v37  ;;  %v1401_v20 = vadd.f32 %v1369_v50, %v1127_v3  ;;  %v4975_v50 = vld [vmem:[#allocation9_spill] sm:$0xff] }
 0x403   : > { %v4401_v4 = vpop.permute.xlu0 %1620 }
 0x404   : > { %v1571_v22 = vpop.permute.xlu1 %1570  ;;  %v1863_v17 = vpack.c.bf16 %v1401_v20, %v1399_v6  ;;  %v1862_v31 = vpack.c.bf16 %v1400_v56, %v1398_v28  ;;  %v1694_v56 = vmul.f32 1.442695, %v1650_v34  ;;  %v1663_v27 = vsub.f32 %v4985_v23, %v4401_v4 }
 0x405   : > { %v1642_v55 = vsub.f32 %v4963_v8, %v1571_v22  ;;  %v1643_v44 = vsub.f32 %v4964_v60, %v1571_v22  ;;  %v4394_v45 = vpop.eup %2851  ;;  %v4977_v8 = vld [vmem:[#allocation36_spill] sm:$0xff] }
 0x406   : > { %1892 = vmatprep.subr.bf16.mxu0 %v1863_v17  ;;  %v4399_v52 = vpop.eup %2853  ;;  %v4976_v17 = vld [vmem:[#allocation49_spill] sm:$0xff] }
 0x407   : > { %v1678_v63 = vmul.f32 1.442695, %v1642_v55  ;;  %v1680_v16 = vmul.f32 1.442695, %v1643_v44  ;;  %1893 = vmatpush1.bf16.xpose.msra.mxu0 %v1862_v31  ;;  %v1654_v55 = vsub.f32 %v4977_v8, %v4383_v21  ;;  %v4978_v44 = vld [vmem:[#allocation50_spill] sm:$0xff]  ;;  %v2048_v23 = vadd.f32 %v4399_v52, %v4394_v45 }
 0x408   : > { %v1581_v1 = vpop.permute.xlu1 %1580 }
 0x409   : > { %v1646_v33 = vsub.f32 %v4965_v36, %v1581_v1  ;;  %v1647_v51 = vsub.f32 %v4966_v39, %v1581_v1  ;;  %2855 = vpow2.f32 %v1678_v63  ;;  %v4979_v1 = vld [vmem:[#allocation62_spill] sm:$0xff] }
 0x40a   : > { %2857 = vpow2.f32 %v1680_v16 }
 0x40b   : > { %v1686_v43 = vmul.f32 1.442695, %v1646_v33  ;;  %v1688_v25 = vmul.f32 1.442695, %v1647_v51  ;;  %v4980_v33 = vld [vmem:[#allocation63_spill] sm:$0xff] }
 0x40c   : > { %v1586_v57 = vpop.permute.xlu1 %1585 }
 0x40d   : > { %v1648_v30 = vsub.f32 %v4968_v19, %v1586_v57  ;;  %v1649_v9 = vsub.f32 %v4969_v24, %v1586_v57  ;;  %2859 = vpow2.f32 %v1686_v43  ;;  %v4981_v43 = vld [vmem:[#allocation38_spill] sm:$0xff]  ;;  %v1702_v19 = vmul.f32 1.442695, %v1654_v55  ;;  %v4982_v24 = vld [vmem:[#allocation8_spill] sm:$0xff] }
 0x40e   : > { %1911 = vmatmul.mubr.bf16.vlgmr.msra.gmra.mxu0 %v1846_v29  ;;  %2861 = vpow2.f32 %v1688_v25  ;;  %v1659_v21 = vsub.f32 %v4981_v43, %v4389_v7 }
 0x40f   : > { %v1690_v40 = vmul.f32 1.442695, %v1648_v30  ;;  %v1692_v13 = vmul.f32 1.442695, %v1649_v9  ;;  %v1658_v9 = vsub.f32 %v4982_v24, %v4389_v7 }
 0x410   : > { %v1596_v58 = vpop.permute.xlu1 %1595 }
 0x411   : > { %2863 = vpow2.f32 %v1690_v40  ;;  %v1653_v5 = vsub.f32 %v4970_v46, %v1596_v58  ;;  %v1652_v47 = vsub.f32 %v4971_v54, %v1596_v58  ;;  %v4983_v54 = vld [vmem:[#allocation64_spill] sm:$0xff]  ;;  %v1710_v7 = vmul.f32 1.442695, %v1658_v9 }
 0x412   : > { %2865 = vpow2.f32 %v1692_v13 }
 0x413   : > { %v1700_v10 = vmul.f32 1.442695, %v1653_v5  ;;  %2867 = vpow2.f32 %v1696_v26  ;;  %v1698_v37 = vmul.f32 1.442695, %v1652_v47  ;;  %v1712_v26 = vmul.f32 1.442695, %v1659_v21 }
 0x414   : > { %v1606_v0 = vpop.permute.xlu1 %1605 }
 0x415   : > { %v1657_v32 = vsub.f32 %v4974_v62, %v1606_v0  ;;  %2869 = vpow2.f32 %v1700_v10  ;;  %v1656_v61 = vsub.f32 %v4975_v50, %v1606_v0  ;;  %v4984_v10 = vld [vmem:[#allocation12_spill] sm:$0xff]  ;;  %v4986_v62 = vld [vmem:[#allocation65_spill] sm:$0xff] }
 0x416   : > { %v2856_v3 = vpop.eup %2855  ;;  %2871 = vpow2.f32 %v1698_v37  ;;  %v4987_v37 = vld [vmem:[#allocation66_spill] sm:$0xff] }
 0x417   : > { %v1708_v48 = vmul.f32 1.442695, %v1657_v32  ;;  %v2858_v6 = vpop.eup %2857  ;;  %v1848_v28 = vpack.c.bf16 %v4394_v45, %v2856_v3  ;;  %v1706_v60 = vmul.f32 1.442695, %v1656_v61 }
 0x418   : > { %v1616_v20 = vpop.permute.xlu1 %1615  ;;  %v1849_v22 = vpack.c.bf16 %v4399_v52, %v2858_v6  ;;  %v4407_v12 = vadd.f32 %v2858_v6, %v2856_v3 }
 0x419   : > { %v1660_v53 = vsub.f32 %v4976_v17, %v1616_v20  ;;  %2873 = vpow2.f32 %v1708_v48  ;;  %v1661_v31 = vsub.f32 %v4978_v44, %v1616_v20  ;;  %v4988_v20 = vld [vmem:[#allocation11_spill] sm:$0xff]  ;;  %v1720_v17 = vmul.f32 1.442695, %v1663_v27 }
 0x41a   : > { %1918 = vmatprep.mubr.bf16.mxu0 %v1849_v22  ;;  %v4412_v16 = vpop.eup %2859  ;;  %2875 = vpow2.f32 %v1694_v56 }
 0x41b   : > { %v1631_v63 = vpop.permute.xlu0 %1630  ;;  %1919 = vmatmul.mubr.bf16.gmra.mxu0 %v1848_v28  ;;  %v4416_v51 = vpop.eup %2861  ;;  %2877 = vpow2.f32 %v1704_v14  ;;  %v1714_v57 = vmul.f32 1.442695, %v1660_v53  ;;  %v1716_v30 = vmul.f32 1.442695, %v1661_v31  ;;  %v1662_v28 = vsub.f32 %v4988_v20, %v4401_v4  ;;  %v4989_v20 = vld [vmem:[#allocation10_spill] sm:$0xff] }
 0x41c   : > { %v1666_v36 = vsub.f32 %v4979_v1, %v1631_v63  ;;  %v1667_v39 = vsub.f32 %v4980_v33, %v1631_v63  ;;  %2879 = vpow2.f32 %v1706_v60 }
 0x41d   : > { %v1718_v44 = vmul.f32 1.442695, %v1662_v28 }
 0x41e   : > { %v4420_v25 = vpop.eup %2863  ;;  %v1726_v29 = vmul.f32 1.442695, %v1666_v36  ;;  %v1728_v11 = vmul.f32 1.442695, %v1667_v39 }
 0x41f   : > { %v4422_v49 = vpop.eup %2865  ;;  %v1850_v58 = vpack.c.bf16 %v4420_v25, %v4412_v16 }
 0x420   : > { %2881 = vpow2.f32 %v1726_v29  ;;  %v1626_v40 = vpop.permute.xlu1 %1625  ;;  %v1851_v13 = vpack.c.bf16 %v4422_v49, %v4416_v51  ;;  %v4430_v46 = vpop.eup %2867 }
 0x421   : > { %2883 = vpow2.f32 %v1728_v11  ;;  %v1665_v47 = vsub.f32 %v4983_v54, %v1626_v40  ;;  %v1664_v59 = vsub.f32 %v4984_v10, %v1626_v40  ;;  %v2054_v10 = vadd.f32 %v4422_v49, %v4420_v25 }
 0x422   : > { %2885 = vpow2.f32 %v1714_v57  ;;  %1926 = vmatprep.mubr.bf16.mxu0 %v1851_v13  ;;  %v4432_v5 = vpop.eup %2869  ;;  %v2051_v49 = vadd.f32 %v4416_v51, %v4412_v16 }
 0x423   : > { %2887 = vpow2.f32 %v1716_v30  ;;  %1927 = vmatmul.mubr.bf16.gmra.mxu0 %v1850_v58  ;;  %v1853_v0 = vpack.c.bf16 %v4432_v5, %v4430_v46  ;;  %v2872_v50 = vpop.eup %2871  ;;  %v1724_v61 = vmul.f32 1.442695, %v1665_v47  ;;  %v1722_v14 = vmul.f32 1.442695, %v1664_v59 }
 0x424   : > { %2889 = vpow2.f32 %v1702_v19  ;;  %v1636_v34 = vpop.permute.xlu1 %1635  ;;  %v2060_v54 = vadd.f32 %v2872_v50, %v4432_v5 }
 0x425   : > { %2891 = vpow2.f32 %v1712_v26  ;;  %v1668_v32 = vsub.f32 %v4986_v62, %v1636_v34  ;;  %v1669_v3 = vsub.f32 %v4987_v37, %v1636_v34  ;;  %1934 = vmatprep.mubr.bf16.mxu0 %v1853_v0 }
 0x426   : > { %v2874_v56 = vpop.eup %2873  ;;  %2893 = vpow2.f32 %v1710_v7 }
 0x427   : > { %v1730_v48 = vmul.f32 1.442695, %v1668_v32  ;;  %v1732_v6 = vmul.f32 1.442695, %v1669_v3  ;;  %v4444_v22 = vpop.eup %2875 }
 0x428   : > { %v2878_v53 = vpop.eup %2877  ;;  %v1852_v8 = vpack.c.bf16 %v2872_v50, %v4444_v22  ;;  %v2057_v25 = vadd.f32 %v4444_v22, %v4430_v46  ;;  %v2018_v22 = vld [vmem:[#allocation3 + $0x58] sm:$0xff] }
 0x429   : > { %2895 = vpow2.f32 %v1730_v48  ;;  %v1855_v55 = vpack.c.bf16 %v2874_v56, %v2878_v53  ;;  %v2880_v60 = vpop.eup %2879 }
 0x42a   : > { %2897 = vpow2.f32 %v1732_v6  ;;  %v2066_v30 = vadd.f32 %v2880_v60, %v2874_v56  ;;  %v2021_v6 = vld [vmem:[#allocation3 + $0x70] sm:$0xff] }
 0x42b   : > { %2899 = vpow2.f32 %v1724_v61  ;;  %1935 = vmatmul.mubr.bf16.gmra.mxu0 %v1852_v8  ;;  %v2037_v28 = vmul.f32 %v4989_v20, %v2021_v6 }
 0x42c   : > { %2901 = vpow2.f32 %v1722_v14  ;;  %1942 = vmatprep.mubr.bf16.mxu0 %v1855_v55 }
 0x42d   : > { %v2882_v31 = vpop.eup %2881  ;;  %2903 = vpow2.f32 %v1720_v17  ;;  %v4459_v45 = vpop.permute.xlu1 %1822 }
 0x42e   : > { %v2884_v63 = vpop.eup %2883  ;;  %2905 = vpow2.f32 %v1718_v44 }
 0x42f   : > { %v2886_v4 = vpop.eup %2885  ;;  %v2081_v1 = vadd.f32 %v2884_v63, %v2882_v31 }
 0x430   : > { %v2888_v36 = vpop.eup %2887 }
 0x431   : > { %v2890_v33 = vpop.eup %2889  ;;  %2082 = vadd.xlane.f32.xlu1 %v2081_v1  ;;  %v2072_v57 = vadd.f32 %v2888_v36, %v2886_v4  ;;  %v4461_v52 = vpop.permute.xlu1 %1812 }
 0x432   : > { %v2892_v39 = vpop.eup %2891  ;;  %v1854_v43 = vpack.c.bf16 %v2880_v60, %v2890_v33  ;;  %v2063_v5 = vadd.f32 %v2890_v33, %v2878_v53  ;;  %v4990_v53 = vld [vmem:[#allocation35_spill] sm:$0xff]  ;;  %v2016_v60 = vld [vmem:[#allocation3 + $0x48] sm:$0xff] }
 0x433   : > { %v1857_v21 = vpack.c.bf16 %v2888_v36, %v2892_v39  ;;  %v2894_v29 = vpop.eup %2893  ;;  %v2034_v8 = vmul.f32 %v4990_v53, %v2018_v22  ;;  %v4992_v33 = vld [vmem:[#allocation51_spill] sm:$0xff]  ;;  %v2008_v22 = vld [vmem:[#allocation3 + $0x8] sm:$0xff] }
 0x434   : > { %1943 = vmatmul.mubr.bf16.gmra.mxu0 %v1854_v43  ;;  %v1856_v58 = vpack.c.bf16 %v2886_v4, %v2894_v29  ;;  %v2069_v27 = vadd.f32 %v2894_v29, %v2892_v39  ;;  %v4991_v4 = vld [vmem:[#allocation53_spill] sm:$0xff]  ;;  %v2014_v43 = vld [vmem:[#allocation3 + $0x38] sm:$0xff]  ;;  %v2020_v29 = vld [vmem:[#allocation3 + $0x68] sm:$0xff] }
 0x435   : > { %1950 = vmatprep.mubr.bf16.mxu0 %v1857_v21  ;;  %2073 = vadd.xlane.f32.xlu1 %v2072_v57  ;;  %v4465_v32 = vpop.permute.xlu1 %1802  ;;  %v2032_v1 = vmul.f32 %v4991_v4, %v2016_v60 }
 0x436   : > { %v2896_v11 = vpop.eup %2895 }
 0x437   : > { %v2898_v19 = vpop.eup %2897  ;;  %v1860_v62 = vpack.c.bf16 %v2896_v11, %v2882_v31 }
 0x438   : > { %v2900_v24 = vpop.eup %2899  ;;  %v2084_v9 = vadd.f32 %v2898_v19, %v2896_v11  ;;  %v1861_v0 = vpack.c.bf16 %v2898_v19, %v2884_v63  ;;  %v2022_v63 = vld [vmem:[#allocation3 + $0x78] sm:$0xff] }
 0x439   : > { %v2902_v40 = vpop.eup %2901  ;;  %2067 = vadd.xlane.f32.xlu1 %v2066_v30  ;;  %v4469_v46 = vpop.permute.xlu1 %1792  ;;  %v2038_v39 = vmul.f32 %v4992_v33, %v2022_v63  ;;  %v2030_v30 = vmul.f32 %v4187_v15, %v2014_v43  ;;  %v4994_v15 = vld [vmem:[#allocation60_spill] sm:$0xff]  ;;  %v4997_v43 = vmov 0.0  }
 0x43a   : > { %v2904_v13 = vpop.eup %2903  ;;  %2085 = vadd.xlane.f32.xlu0 %v2084_v9  ;;  %v2078_v47 = vadd.f32 %v2902_v40, %v2900_v24  ;;  %v4993_v9 = vld [vmem:[#allocation43_spill] sm:$0xff]  ;;  %v4996_v33 = vld [vmem:[#allocation52_spill] sm:$0xff]  ;;  %2656 = vmatprep.mubr.msk.f32.mxu1 %vm3023_vm1, %v4997_v43 }
 0x43b   : > { %v1859_v26 = vpack.c.bf16 %v2900_v24, %v2904_v13  ;;  %v2906_v7 = vpop.eup %2905 }
 0x43c   : > { %1951 = vmatmul.mubr.bf16.gmra.mxu0 %v1856_v58  ;;  %v2075_v59 = vadd.f32 %v2906_v7, %v2904_v13  ;;  %v1858_v34 = vpack.c.bf16 %v2902_v40, %v2906_v7  ;;  %v2036_v40 = vmul.f32 %v4993_v9, %v2020_v29  ;;  %v2012_v13 = vld [vmem:[#allocation3 + $0x28] sm:$0xff]  ;;  %v2013_v29 = vld [vmem:[#allocation3 + $0x30] sm:$0xff] }
 0x43d   : > { %1958 = vmatprep.mubr.bf16.mxu0 %v1859_v26  ;;  %2061 = vadd.xlane.f32.xlu1 %v2060_v54  ;;  %v4473_v16 = vpop.permute.xlu1 %1782  ;;  %v2019_v54 = vld [vmem:[#allocation3 + $0x60] sm:$0xff]  ;;  %v4998_v9 = vld [vmem:[#allocation40_spill] sm:$0xff] }
 0x43e   : > { %2079 = vadd.xlane.f32.xlu0 %v2078_v47 }
 0x441   : > { %2055 = vadd.xlane.f32.xlu1 %v2054_v10  ;;  %v2028_v10 = vmul.f32 %v4199_v2, %v2012_v13 }
 0x442   : > { %2076 = vadd.xlane.f32.xlu0 %v2075_v59 }
 0x444   : > { %1959 = vmatmul.mubr.bf16.gmra.mxu0 %v1858_v34  ;;  %v2035_v34 = vmul.f32 %v4994_v15, %v2019_v54 }
 0x445   : > { %1966 = vmatprep.mubr.bf16.mxu0 %v1861_v0  ;;  %2049 = vadd.xlane.f32.xlu1 %v2048_v23  ;;  %v2010_v0 = vld [vmem:[#allocation3 + $0x18] sm:$0xff] }
 0x446   : > { %2070 = vadd.xlane.f32.xlu0 %v2069_v27  ;;  %v2026_v6 = vmul.f32 %v4196_v18, %v2010_v0  ;;  %v2024_v18 = vmul.f32 %v4177_v41, %v2008_v22 }
 0x449   : > { %2043 = vadd.xlane.f32.xlu1 %v4372_v38  ;;  %v4463_v38 = vpop.permute.xlu0 %1827 }
 0x44a   : > { %2064 = vadd.xlane.f32.xlu0 %v2063_v5  ;;  %v2017_v5 = vld [vmem:[#allocation3 + $0x50] sm:$0xff] }
 0x44c   : > { %1967 = vmatmul.mubr.bf16.gmra.mxu0 %v1860_v62 }
 0x44d   : > { %v4467_v37 = vpop.permute.xlu0 %1817 }
 0x44e   : > { %2058 = vadd.xlane.f32.xlu0 %v2057_v25 }
 0x451   : > { %v4471_v3 = vpop.permute.xlu0 %1807 }
 0x452   : > { %2052 = vadd.xlane.f32.xlu0 %v2051_v49 }
 0x455   : > { %v4475_v51 = vpop.permute.xlu0 %1797 }
 0x456   : > { %2046 = vadd.xlane.f32.xlu0 %v4407_v12  ;;  %v4477_v12 = vpop.permute.xlu1 %1772 }
 0x45a   : > { %2040 = vadd.xlane.f32.xlu0 %v4354_v42  ;;  %v4479_v42 = vpop.permute.xlu0 %1787  ;;  %v4481_v50 = vpop.permute.xlu1 %1762 }
 0x45e   : > { %v4483_v61 = vpop.permute.xlu0 %1777  ;;  %v4485_v48 = vpop.permute.xlu1 %1752 }
 0x462   : > { %v4487_v56 = vpop.permute.xlu0 %1767 }
 0x466   : > { %v4492_v44 = vpop.permute.xlu0 %1757 }
 0x4ba   : > { %v2083_v14 = vpop.xlane.xlu1 %2082 }
 0x4bb   : > { %v2101_v17 = vadd.f32 %v2083_v14, %v2037_v28  ;;  %v4995_v28 = vld [vmem:[#allocation48_spill] sm:$0xff] }
 0x4bc   : > { %v2033_v14 = vmul.f32 %v4995_v28, %v2017_v5  ;;  %v5000_v28 = vld [vmem:[#allocation27_spill] sm:$0xff] }
 0x4bd   : > { %2118 = vst.msk [vmem:[#allocation3 + $0x70] sm:$0xff] %vm283_vm0, %v2101_v17 }
 0x4be   : > { %v2074_v55 = vpop.xlane.xlu1 %2073 }
 0x4bf   : > { %v2098_v31 = vadd.f32 %v2074_v55, %v2034_v8  ;;  %v2015_v8 = vld [vmem:[#allocation3 + $0x40] sm:$0xff] }
 0x4c1   : > { %2115 = vst.msk [vmem:[#allocation3 + $0x58] sm:$0xff] %vm283_vm0, %v2098_v31 }
 0x4c2   : > { %v2068_v36 = vpop.xlane.xlu1 %2067 }
 0x4c3   : > { %v2096_v21 = vadd.f32 %v2068_v36, %v2032_v1  ;;  %v2086_v57 = vpop.xlane.xlu0 %2085 }
 0x4c4   : > { %v2288_v11 = vld [vmem:[#allocation3 + $0x70] sm:$0xff]  ;;  %v2102_v19 = vadd.f32 %v2086_v57, %v2038_v39  ;;  %v2031_v39 = vmul.f32 %v4996_v33, %v2015_v8  ;;  %v1834_v33 = vmul.f32 0.0, %v4477_v12 }
 0x4c5   : > { %2907 = vrcp.f32 %v2288_v11  ;;  %2113 = vst.msk [vmem:[#allocation3 + $0x48] sm:$0xff] %vm283_vm0, %v2096_v21 }
 0x4c6   : > { %2119 = vst.msk [vmem:[#allocation3 + $0x78] sm:$0xff] %vm283_vm0, %v2102_v19  ;;  %v2062_v24 = vpop.xlane.xlu1 %2061 }
 0x4c7   : > { %v2094_v58 = vadd.f32 %v2062_v24, %v2030_v30  ;;  %v2080_v26 = vpop.xlane.xlu0 %2079 }
 0x4c8   : > { %v2285_v47 = vld [vmem:[#allocation3 + $0x58] sm:$0xff]  ;;  %v2100_v7 = vadd.f32 %v2080_v26, %v2036_v40  ;;  %v2029_v40 = vmul.f32 %v4998_v9, %v2013_v29 }
 0x4c9   : > { %2909 = vrcp.f32 %v2285_v47  ;;  %2111 = vst.msk [vmem:[#allocation3 + $0x38] sm:$0xff] %vm283_vm0, %v2094_v58  ;;  %v2011_v58 = vld [vmem:[#allocation3 + $0x20] sm:$0xff] }
 0x4ca   : > { %2117 = vst.msk [vmem:[#allocation3 + $0x68] sm:$0xff] %vm283_vm0, %v2100_v7  ;;  %v2056_v59 = vpop.xlane.xlu1 %2055 }
 0x4cb   : > { %v2092_v23 = vadd.f32 %v2056_v59, %v2028_v10  ;;  %v2077_v27 = vpop.xlane.xlu0 %2076  ;;  %v4999_v10 = vld [vmem:[#allocation30_spill] sm:$0xff] }
 0x4cc   : > { %v2283_v62 = vld [vmem:[#allocation3 + $0x48] sm:$0xff]  ;;  %v2099_v25 = vadd.f32 %v2077_v27, %v2035_v34  ;;  %v2027_v59 = vmul.f32 %v4999_v10, %v2011_v58  ;;  %v1832_v34 = vmul.f32 0.0, %v4481_v50  ;;  %v1833_v50 = vmul.f32 0.0, %v4487_v56 }
 0x4cd   : > { %2911 = vrcp.f32 %v2283_v62  ;;  %v2289_v49 = vld [vmem:[#allocation3 + $0x78] sm:$0xff]  ;;  %2109 = vst.msk [vmem:[#allocation3 + $0x28] sm:$0xff] %vm283_vm0, %v2092_v23  ;;  %v2009_v23 = vld [vmem:[#allocation3 + $0x10] sm:$0xff]  ;;  %v1836_v58 = vmul.f32 0.0, %v4473_v16  ;;  %v1837_v10 = vmul.f32 0.0, %v4479_v42 }
 0x4ce   : > { %2913 = vrcp.f32 %v2289_v49  ;;  %2116 = vst.msk [vmem:[#allocation3 + $0x60] sm:$0xff] %vm283_vm0, %v2099_v25  ;;  %v2050_v2 = vpop.xlane.xlu1 %2049  ;;  %v4508_v20 = vpop.f32.mrf.mxu0 }
 0x4cf   : > { %v2090_v17 = vadd.f32 %v2050_v2, %v2026_v6  ;;  %v2071_v53 = vpop.xlane.xlu0 %2070 }
 0x4d0   : > { %v2281_v55 = vld [vmem:[#allocation3 + $0x38] sm:$0xff]  ;;  %v2097_v60 = vadd.f32 %v2071_v53, %v2033_v14  ;;  %v1914_v31 = vpop.f32.mrf.mxu0  ;;  %v2025_v14 = vmul.f32 %v5000_v28, %v2009_v23  ;;  %v2007_v53 = vld [vmem:[#allocation3] sm:$0xff] }
 0x4d1   : > { %2915 = vrcp.f32 %v2281_v55  ;;  %v2287_v63 = vld [vmem:[#allocation3 + $0x68] sm:$0xff]  ;;  %2107 = vst.msk [vmem:[#allocation3 + $0x18] sm:$0xff] %vm283_vm0, %v2090_v17 }
 0x4d2   : > { %v2908_v4 = vpop.eup %2907  ;;  %2917 = vrcp.f32 %v2287_v63  ;;  %2114 = vst.msk [vmem:[#allocation3 + $0x50] sm:$0xff] %vm283_vm0, %v2097_v60  ;;  %v2044_v1 = vpop.xlane.xlu1 %2043 }
 0x4d3   : > { %v4514_v36 = vpop.f32.mrf.mxu0  ;;  %v2088_v21 = vadd.f32 %v2044_v1, %v2024_v18  ;;  %2394 = vperm.xlu0 %2810, %v2908_v4   ;;  %v2065_v57 = vpop.xlane.xlu0 %2064  ;;  %v2023_v4 = vmul.f32 %v4168_v35, %v2007_v53 }
 0x4d4   : > { %v2279_v11 = vld [vmem:[#allocation3 + $0x28] sm:$0xff]  ;;  %v2095_v19 = vadd.f32 %v2065_v57, %v2031_v39 }
 0x4d5   : > { %v1917_v41 = vpop.f32.mrf.mxu0  ;;  %2919 = vrcp.f32 %v2279_v11  ;;  %v2286_v30 = vld [vmem:[#allocation3 + $0x60] sm:$0xff]  ;;  %2105 = vst.msk [vmem:[#allocation3 + $0x8] sm:$0xff] %vm283_vm0, %v2088_v21 }
 0x4d6   : > { %v2910_v24 = vpop.eup %2909  ;;  %2921 = vrcp.f32 %v2286_v30  ;;  %2112 = vst.msk [vmem:[#allocation3 + $0x40] sm:$0xff] %vm283_vm0, %v2095_v19  ;;  %v1835_v30 = vmul.f32 0.0, %v4483_v61 }
 0x4d7   : > { %2379 = vperm.xlu0 %2810, %v2910_v24   ;;  %v2059_v13 = vpop.xlane.xlu0 %2058 }
 0x4d8   : > { %v2277_v26 = vld [vmem:[#allocation3 + $0x18] sm:$0xff]  ;;  %v2093_v54 = vadd.f32 %v2059_v13, %v2029_v40 }
 0x4d9   : > { %2923 = vrcp.f32 %v2277_v26  ;;  %v2284_v47 = vld [vmem:[#allocation3 + $0x50] sm:$0xff] }
 0x4da   : > { %v2912_v7 = vpop.eup %2911  ;;  %2925 = vrcp.f32 %v2284_v47  ;;  %2110 = vst.msk [vmem:[#allocation3 + $0x30] sm:$0xff] %vm283_vm0, %v2093_v54 }
 0x4db   : > { %v2914_v15 = vpop.eup %2913  ;;  %2369 = vperm.xlu0 %2810, %v2912_v7   ;;  %v2053_v0 = vpop.xlane.xlu0 %2052 }
 0x4dc   : > { %v2275_v27 = vld [vmem:[#allocation3 + $0x8] sm:$0xff]  ;;  %v1920_v5 = vpop.f32.mrf.mxu0  ;;  %v2091_v62 = vadd.f32 %v2053_v0, %v2027_v59  ;;  %2399 = vperm.xlu1 %2809, %v2914_v15  }
 0x4dd   : > { %2927 = vrcp.f32 %v2275_v27  ;;  %v2282_v25 = vld [vmem:[#allocation3 + $0x40] sm:$0xff]  ;;  %v4525_v49 = vadd.f32 %v1920_v5, %v1832_v34 }
 0x4de   : > { %v2916_v6 = vpop.eup %2915  ;;  %2929 = vrcp.f32 %v2282_v25  ;;  %2108 = vst.msk [vmem:[#allocation3 + $0x20] sm:$0xff] %vm283_vm0, %v2091_v62  ;;  %v1922_v2 = vpop.f32.mrf.mxu0 }
 0x4df   : > { %v2918_v22 = vpop.eup %2917  ;;  %2359 = vperm.xlu0 %2810, %v2916_v6   ;;  %v2047_v17 = vpop.xlane.xlu0 %2046 }
 0x4e0   : > { %v1923_v8 = vpop.f32.mrf.mxu0  ;;  %v2089_v55 = vadd.f32 %v2047_v17, %v2025_v14  ;;  %2389 = vperm.xlu1 %2809, %v2918_v22  }
 0x4e1   : > { %v2280_v60 = vld [vmem:[#allocation3 + $0x30] sm:$0xff]  ;;  %v4530_v31 = vadd.f32 %v1923_v8, %v1833_v50 }
 0x4e2   : > { %v2920_v63 = vpop.eup %2919  ;;  %2931 = vrcp.f32 %v2280_v60  ;;  %2106 = vst.msk [vmem:[#allocation3 + $0x10] sm:$0xff] %vm283_vm0, %v2089_v55  ;;  %v1925_v18 = vpop.f32.mrf.mxu0  ;;  %v1845_v55 = vmul.f32 0.0, %v4463_v38 }
 0x4e3   : > { %v2922_v1 = vpop.eup %2921  ;;  %2349 = vperm.xlu0 %2810, %v2920_v63   ;;  %v2041_v56 = vpop.xlane.xlu0 %2040  ;;  %v2170_v63 = vld [vmem:[%s4753_s5 + $0x78] sm:$0xff]  ;;  %v1844_v18 = vmul.f32 0.0, %v4459_v45  ;;  %v1842_v45 = vmul.f32 0.0, %v4461_v52 }
 0x4e4   : > { %v1928_v39 = vpop.f32.mrf.mxu0  ;;  %v2087_v21 = vadd.f32 %v2041_v56, %v2023_v4  ;;  %2384 = vperm.xlu1 %2809, %v2922_v1   ;;  %v2166_v52 = vld [vmem:[%s4753_s5 + $0x58] sm:$0xff] }
 0x4e5   : > { %v2278_v57 = vld [vmem:[#allocation3 + $0x20] sm:$0xff]  ;;  %v4535_v29 = vadd.f32 %v1928_v39, %v1834_v33  ;;  %v2169_v39 = vld [vmem:[%s4753_s5 + $0x70] sm:$0xff] }
 0x4e6   : > { %v2924_v11 = vpop.eup %2923  ;;  %2933 = vrcp.f32 %v2278_v57  ;;  %2104 = vst.msk [vmem:[#allocation3] sm:$0xff] %vm283_vm0, %v2087_v21  ;;  %v1930_v19 = vpop.f32.mrf.mxu0  ;;  %v1843_v21 = vmul.f32 0.0, %v4467_v37  ;;  %v2167_v37 = vld [vmem:[%s4753_s5 + $0x60] sm:$0xff] }
 0x4e7   : > { %v2926_v41 = vpop.eup %2925  ;;  %2339 = vperm.xlu0 %2810, %v2924_v11   ;;  %v2168_v11 = vld [vmem:[%s4753_s5 + $0x68] sm:$0xff] }
 0x4e8   : > { %v1931_v35 = vpop.f32.mrf.mxu0  ;;  %2374 = vperm.xlu1 %2809, %v2926_v41  }
 0x4e9   : > { %v2276_v12 = vld [vmem:[#allocation3 + $0x10] sm:$0xff]  ;;  %v4539_v24 = vadd.f32 %v1931_v35, %v1835_v30  ;;  %v1841_v30 = vmul.f32 0.0, %v4471_v3 }
 0x4ea   : > { %v2928_v9 = vpop.eup %2927  ;;  %2935 = vrcp.f32 %v2276_v12  ;;  %v1933_v40 = vpop.f32.mrf.mxu0  ;;  %v2165_v3 = vld [vmem:[%s4753_s5 + $0x50] sm:$0xff] }
 0x4eb   : > { %v2930_v13 = vpop.eup %2929  ;;  %2329 = vperm.xlu0 %2810, %v2928_v9   ;;  %v1840_v9 = vmul.f32 0.0, %v4465_v32  ;;  %v2164_v32 = vld [vmem:[%s4753_s5 + $0x48] sm:$0xff] }
 0x4ec   : > { %v1936_v26 = vpop.f32.mrf.mxu0  ;;  %2364 = vperm.xlu1 %2809, %v2930_v13  }
 0x4ed   : > { %v2274_v54 = vld [vmem:[#allocation3] sm:$0xff]  ;;  %v4542_v47 = vadd.f32 %v1936_v26, %v1836_v58  ;;  %v1839_v58 = vmul.f32 0.0, %v4475_v51 }
 0x4ee   : > { %2937 = vrcp.f32 %v2274_v54  ;;  %v1938_v61 = vpop.f32.mrf.mxu0  ;;  %v2163_v51 = vld [vmem:[%s4753_s5 + $0x40] sm:$0xff] }
 0x4ef   : > { %v2932_v7 = vpop.eup %2931  ;;  %v1838_v61 = vmul.f32 0.0, %v4469_v46 }
 0x4f0   : > { %v1939_v59 = vpop.f32.mrf.mxu0  ;;  %2354 = vperm.xlu1 %2809, %v2932_v7  }
 0x4f1   : > { %v4545_v15 = vadd.f32 %v1939_v59, %v1837_v10 }
 0x4f2   : > { %v1941_v34 = vpop.f32.mrf.mxu0 }
 0x4f3   : > { %v2934_v0 = vpop.eup %2933  ;;  %v2162_v34 = vld [vmem:[%s4753_s5 + $0x38] sm:$0xff] }
 0x4f4   : > { %v1944_v23 = vpop.f32.mrf.mxu0  ;;  %2344 = vperm.xlu1 %2809, %v2934_v0   ;;  %v2178_v46 = vmul.f32 %v2162_v34, %v4545_v15  ;;  %v2161_v0 = vld [vmem:[%s4753_s5 + $0x30] sm:$0xff]  ;;  %v2159_v15 = vld [vmem:[%s4753_s5 + $0x20] sm:$0xff] }
 0x4f5   : > { %v1983_v7 = vadd.f32 %v1944_v23, %v1838_v61  ;;  %v2177_v23 = vmul.f32 %v2161_v0, %v4542_v47  ;;  %v2158_v47 = vld [vmem:[%s4753_s5 + $0x18] sm:$0xff]  ;;  %v2258_v0 = vld [vmem:[%s4751_s3] sm:$0xff] }
 0x4f6   : > { %v1946_v16 = vpop.f32.mrf.mxu0 }
 0x4f7   : > { %v2936_v27 = vpop.eup %2935  ;;  %v2179_v59 = vmul.f32 %v2163_v51, %v1983_v7  ;;  %v2160_v16 = vld [vmem:[%s4753_s5 + $0x28] sm:$0xff]  ;;  %v2260_v7 = vld [vmem:[%s4751_s3 + $0x10] sm:$0xff] }
 0x4f8   : > { %v1947_v5 = vpop.f32.mrf.mxu0  ;;  %2334 = vperm.xlu1 %2809, %v2936_v27   ;;  %v2176_v27 = vmul.f32 %v2160_v16, %v4539_v24  ;;  %v2157_v24 = vld [vmem:[%s4753_s5 + $0x10] sm:$0xff]  ;;  %v2259_v51 = vld [vmem:[%s4751_s3 + $0x8] sm:$0xff] }
 0x4f9   : > { %v1984_v26 = vadd.f32 %v1947_v5, %v1839_v58  ;;  %v2175_v5 = vmul.f32 %v2159_v15, %v4535_v29  ;;  %v2262_v58 = vld [vmem:[%s4751_s3 + $0x20] sm:$0xff] }
 0x4fa   : > { %v1949_v62 = vpop.f32.mrf.mxu0 }
 0x4fb   : > { %v2938_v25 = vpop.eup %2937  ;;  %v2180_v10 = vmul.f32 %v2164_v32, %v1984_v26  ;;  %v2174_v62 = vmul.f32 %v2158_v47, %v4530_v31 }
 0x4fc   : > { %v1952_v6 = vpop.f32.mrf.mxu0  ;;  %2324 = vperm.xlu1 %2809, %v2938_v25   ;;  %v1831_v25 = vmul.f32 0.0, %v4492_v44  ;;  %v2155_v44 = vld [vmem:[%s4753_s5] sm:$0xff] }
 0x4fd   : > { %v1985_v40 = vadd.f32 %v1952_v6, %v1840_v9  ;;  %v2173_v6 = vmul.f32 %v2157_v24, %v4525_v49  ;;  %v2263_v9 = vld [vmem:[%s4751_s3 + $0x28] sm:$0xff] }
 0x4fe   : > { %v1954_v2 = vpop.f32.mrf.mxu0  ;;  %v1976_v29 = vadd.f32 %v4514_v36, %v1831_v25 }
 0x4ff   : > { %v2181_v54 = vmul.f32 %v2165_v3, %v1985_v40  ;;  %v2156_v2 = vld [vmem:[%s4753_s5 + $0x8] sm:$0xff] }
 0x500   : > { %v1955_v28 = vpop.f32.mrf.mxu0 }
 0x501   : > { %v1986_v35 = vadd.f32 %v1955_v28, %v1841_v30  ;;  %v1830_v28 = vmul.f32 0.0, %v4485_v48  ;;  %v2187_v48 = vld [vmem:[%s4752_s4] sm:$0xf] }
 0x502   : > { %v1957_v14 = vpop.f32.mrf.mxu0 }
 0x503   : > { %v2182_v13 = vmul.f32 %v2166_v52, %v1986_v35  ;;  %v1975_v31 = vadd.f32 %v4508_v20, %v1830_v28  ;;  %v2172_v14 = vmul.f32 %v2156_v2, %v1976_v29  ;;  %v2273_v20 = vld [vmem:[%s4751_s3 + $0x78] sm:$0xff] }
 0x504   : > { %v1960_v42 = vpop.f32.mrf.mxu0 }
 0x505   : > { %v1987_v19 = vadd.f32 %v1960_v42, %v1842_v45  ;;  %v2171_v36 = vmul.f32 %v2155_v44, %v1975_v31  ;;  %v2266_v45 = vld [vmem:[%s4751_s3 + $0x40] sm:$0xff] }
 0x506   : > { %v1962_v22 = vpop.f32.mrf.mxu0 }
 0x507   : > { %v2183_v12 = vmul.f32 %v2167_v37, %v1987_v19  ;;  %v2272_v22 = vld [vmem:[%s4751_s3 + $0x70] sm:$0xff] }
 0x508   : > { %v1963_v50 = vpop.f32.mrf.mxu0 }
 0x509   : > { %v1988_v38 = vadd.f32 %v1963_v50, %v1843_v21 }
 0x50a   : > { %v1965_v17 = vpop.f32.mrf.mxu0 }
 0x50b   : > { %v2184_v41 = vmul.f32 %v2168_v11, %v1988_v38  ;;  %v2267_v38 = vld [vmem:[%s4751_s3 + $0x48] sm:$0xff] }
 0x50c   : > { %v1968_v53 = vpop.f32.mrf.mxu0 }
 0x50d   : > { %v1989_v33 = vadd.f32 %v1968_v53, %v1844_v18  ;;  %v2271_v53 = vld [vmem:[%s4751_s3 + $0x68] sm:$0xff]  ;;  %v2270_v18 = vld [vmem:[%s4751_s3 + $0x60] sm:$0xff] }
 0x50e   : > { %v1970_v8 = vpop.f32.mrf.mxu0 }
 0x50f   : > { %v2185_v57 = vmul.f32 %v2169_v39, %v1989_v33  ;;  %v2268_v39 = vld [vmem:[%s4751_s3 + $0x50] sm:$0xff] }
 0x510   : > { %v1971_v60 = vpop.f32.mrf.mxu0 }
 0x511   : > { %v1990_v4 = vadd.f32 %v1971_v60, %v1845_v55 }
 0x512   : > { %v1973_v1 = vpop.f32.mrf.mxu0 }
 0x513   : > { %v2186_v56 = vmul.f32 %v2170_v63, %v1990_v4  ;;  %v2269_v4 = vld [vmem:[%s4751_s3 + $0x58] sm:$0xff] }
 0x515   : > { %2625 = vmatpush3.xpose.msra.mxu1 %v2186_v56 }
 0x516   : > { %2626 = vmatprep.subr.mxu1 %v4997_v43 }
 0x519   : > { %2627 = vmatpush3.xpose.msra.mxu1 %v2185_v57 }
 0x51a   : > { %2628 = vmatprep.subr.mxu1 %v4997_v43 }
 0x51d   : > { %2629 = vmatpush3.xpose.msra.mxu1 %v2184_v41  ;;  %v2265_v41 = vld [vmem:[%s4751_s3 + $0x38] sm:$0xff] }
 0x51e   : > { %2630 = vmatprep.subr.mxu1 %v4997_v43 }
 0x521   : > { %2631 = vmatpush3.xpose.msra.mxu1 %v2183_v12  ;;  %v2264_v12 = vld [vmem:[%s4751_s3 + $0x30] sm:$0xff] }
 0x522   : > { %2632 = vmatprep.subr.mxu1 %v4997_v43 }
 0x525   : > { %2633 = vmatpush3.xpose.msra.mxu1 %v2182_v13 }
 0x526   : > { %2634 = vmatprep.subr.mxu1 %v4997_v43 }
 0x529   : > { %2635 = vmatpush3.xpose.msra.mxu1 %v2181_v54  ;;  %v2261_v54 = vld [vmem:[%s4751_s3 + $0x18] sm:$0xff] }
 0x52a   : > { %2636 = vmatprep.subr.mxu1 %v4997_v43 }
 0x52d   : > { %2637 = vmatpush3.xpose.msra.mxu1 %v2180_v10 }
 0x52e   : > { %2638 = vmatprep.subr.mxu1 %v4997_v43 }
 0x531   : > { %2639 = vmatpush3.xpose.msra.mxu1 %v2179_v59 }
 0x532   : > { %2640 = vmatprep.subr.mxu1 %v4997_v43 }
 0x535   : > { %2641 = vmatpush3.xpose.msra.mxu1 %v2178_v46 }
 0x536   : > { %2642 = vmatprep.subr.mxu1 %v4997_v43 }
 0x539   : > { %2643 = vmatpush3.xpose.msra.mxu1 %v2177_v23 }
 0x53a   : > { %2644 = vmatprep.subr.mxu1 %v4997_v43 }
 0x53d   : > { %2645 = vmatpush3.xpose.msra.mxu1 %v2176_v27 }
 0x53e   : > { %2646 = vmatprep.subr.mxu1 %v4997_v43 }
 0x541   : > { %2647 = vmatpush3.xpose.msra.mxu1 %v2175_v5 }
 0x542   : > { %2648 = vmatprep.subr.mxu1 %v4997_v43 }
 0x545   : > { %2649 = vmatpush3.xpose.msra.mxu1 %v2174_v62 }
 0x546   : > { %2650 = vmatprep.subr.mxu1 %v4997_v43 }
 0x549   : > { %2651 = vmatpush3.xpose.msra.mxu1 %v2173_v6 }
 0x54a   : > { %2652 = vmatprep.subr.mxu1 %v4997_v43 }
 0x54d   : > { %2653 = vmatpush3.xpose.msra.mxu1 %v2172_v14 }
 0x54e   : > { %2654 = vmatprep.subr.mxu1 %v4997_v43  ;;  %v2395_v49 = vpop.permute.xlu0 %2394 }
 0x54f   : > { %v2416_v8 = vmul.f32 %v2395_v49, %v2272_v22 }
 0x551   : > { %2655 = vmatpush3.xpose.msra.mxu1 %v2171_v36 }
 0x552   : > { %2659 = vmatprep.subr.mxu1 %v4997_v43  ;;  %v2380_v42 = vpop.permute.xlu0 %2379 }
 0x553   : > { %v2413_v21 = vmul.f32 %v2380_v42, %v2269_v4 }
 0x554   : > { %2657 = vmatmul.mubr.f32.vlgmr.msra.gmra.mxu1 %v2187_v48 }
 0x555   : > { %2691 = vmatprep.mubr.msk.f32.mxu1 %vm3023_vm1, %v4997_v43 }
 0x556   : > { %v2370_v55 = vpop.permute.xlu0 %2369 }
 0x557   : > { %v2400_v50 = vpop.permute.xlu1 %2399  ;;  %v2411_v19 = vmul.f32 %v2370_v55, %v2267_v38 }
 0x558   : > { %v2417_v17 = vmul.f32 %v2400_v50, %v2273_v20 }
 0x55a   : > { %2660 = vmatpush3.msra.mxu1 %v2417_v17  ;;  %v2360_v56 = vpop.permute.xlu0 %2359 }
 0x55b   : > { %2661 = vmatprep.subr.mxu1 %v4997_v43  ;;  %v2390_v60 = vpop.permute.xlu1 %2389  ;;  %v2409_v52 = vmul.f32 %v2360_v56, %v2265_v41 }
 0x55c   : > { %v2415_v63 = vmul.f32 %v2390_v60, %v2271_v53  ;;  %2662 = vmatpush3.msra.mxu1 %v2416_v8 }
 0x55d   : > { %2663 = vmatprep.subr.mxu1 %v4997_v43 }
 0x55e   : > { %2664 = vmatpush3.msra.mxu1 %v2415_v63  ;;  %v2350_v37 = vpop.permute.xlu0 %2349 }
 0x55f   : > { %v2385_v1 = vpop.permute.xlu1 %2384  ;;  %2665 = vmatprep.subr.mxu1 %v4997_v43  ;;  %v2407_v26 = vmul.f32 %v2350_v37, %v2263_v9 }
 0x560   : > { %v2414_v33 = vmul.f32 %v2385_v1, %v2270_v18 }
 0x562   : > { %2666 = vmatpush3.msra.mxu1 %v2414_v33  ;;  %v2340_v3 = vpop.permute.xlu0 %2339 }
 0x563   : > { %v2375_v57 = vpop.permute.xlu1 %2374  ;;  %2667 = vmatprep.subr.mxu1 %v4997_v43  ;;  %v2405_v10 = vmul.f32 %v2340_v3, %v2261_v54 }
 0x564   : > { %v2412_v11 = vmul.f32 %v2375_v57, %v2268_v39  ;;  %2668 = vmatpush3.msra.mxu1 %v2413_v21 }
 0x565   : > { %2669 = vmatprep.subr.mxu1 %v4997_v43 }
 0x566   : > { %2670 = vmatpush3.msra.mxu1 %v2412_v11  ;;  %v2330_v59 = vpop.permute.xlu0 %2329 }
 0x567   : > { %v2365_v30 = vpop.permute.xlu1 %2364  ;;  %2671 = vmatprep.subr.mxu1 %v4997_v43  ;;  %v2403_v23 = vmul.f32 %v2330_v59, %v2259_v51 }
 0x568   : > { %v2410_v35 = vmul.f32 %v2365_v30, %v2266_v45  ;;  %2672 = vmatpush3.msra.mxu1 %v2411_v19 }
 0x569   : > { %2673 = vmatprep.subr.mxu1 %v4997_v43 }
 0x56a   : > { %2674 = vmatpush3.msra.mxu1 %v2410_v35 }
 0x56b   : > { %v2355_v40 = vpop.permute.xlu1 %2354  ;;  %2675 = vmatprep.subr.mxu1 %v4997_v43 }
 0x56c   : > { %v2408_v13 = vmul.f32 %v2355_v40, %v2264_v12  ;;  %2676 = vmatpush3.msra.mxu1 %v2409_v52 }
 0x56d   : > { %2677 = vmatprep.subr.mxu1 %v4997_v43 }
 0x56e   : > { %2678 = vmatpush3.msra.mxu1 %v2408_v13 }
 0x56f   : > { %v2345_v32 = vpop.permute.xlu1 %2344  ;;  %2679 = vmatprep.subr.mxu1 %v4997_v43 }
 0x570   : > { %v2406_v61 = vmul.f32 %v2345_v32, %v2262_v58  ;;  %2680 = vmatpush3.msra.mxu1 %v2407_v26 }
 0x571   : > { %2681 = vmatprep.subr.mxu1 %v4997_v43 }
 0x572   : > { %2682 = vmatpush3.msra.mxu1 %v2406_v61 }
 0x573   : > { %v2335_v34 = vpop.permute.xlu1 %2334  ;;  %2683 = vmatprep.subr.mxu1 %v4997_v43 }
 0x574   : > { %v2404_v46 = vmul.f32 %v2335_v34, %v2260_v7  ;;  %2684 = vmatpush3.msra.mxu1 %v2405_v10 }
 0x575   : > { %2685 = vmatprep.subr.mxu1 %v4997_v43 }
 0x576   : > { %2686 = vmatpush3.msra.mxu1 %v2404_v46 }
 0x577   : > { %v2325_v16 = vpop.permute.xlu1 %2324  ;;  %2687 = vmatprep.subr.mxu1 %v4997_v43 }
 0x578   : > { %v2402_v27 = vmul.f32 %v2325_v16, %v2258_v0  ;;  %2688 = vmatpush3.msra.mxu1 %v2403_v23 }
 0x579   : > { %2689 = vmatprep.subr.mxu1 %v4997_v43 }
 0x57a   : > { %2690 = vmatpush3.msra.mxu1 %v2402_v27 }
 0x614   : > { %v2254_v15 = vpop.f32.mrf.mxu1 }
 0x615   : > { %2692 = vmatmul.mubr.f32.vlgmr.msra.gmra.mxu1 %v2254_v15 }
 0x616   : > { %v2658_v5 = vpop.f32.mrf.mxu1 }
 0x6d5   : > { %v2484_v43 = vpop.f32.mrf.mxu1 }
 0x6d6   : > { %2489 = vst.msk [vmem:[%s267_s30] sm:$0xf] %vm2488_vm2, %v2484_v43 }
 0x6d7   : > { %v2693_v47 = vpop.f32.mrf.mxu1 }
 0x6d8   : > { %2952 = shalt.err (!%p2949_p5)
}
 0x6d9   : > { %s2953_s18 = scalar_lea.hbm %s4702_s13, 64  ;;  %s2957_s27 = scalar_lea.hbm %s4754_s6, 128 }
 0x6da   : > { %p2954_p6 = scmp.ne.s32.totalorder %s4702_s13, %s2953_s18  ;;  %p2958_p10 = scmp.lt.s32.totalorder %s4702_s13, %s4754_s6 }
 0x6db   : > { %p2959_p11 = scmp.lt.s32.totalorder %s2957_s27, %s2953_s18 }
 0x6dc   : > { %p2955_p7 = pnand %p2954_p6, %p3100_p4 }
 0x6dd   : > { %p2960_p12 = por %p2959_p11, %p2958_p10 }
 0x6de   : > { %p2956_p9 = pneg %p2955_p7 }
 0x6e0   : > { %p2961_p13 = pnand %p2960_p12, %p2956_p9 }
 0x6e2   : > { %2964 = shalt.err (!%p2961_p13)
}
 0x6e3   : > { %2694 = dma.vmem_to_hbm [thread:$0]  (%p3100_p4), %s4704_s8, 64, %s4702_s13, %s2491_s14  }
 0x6e4 PF: > { %p2700_p0 = scmp.ge.s32.totalorder %s3015_s26, 2  ;;  %s2516_s11 = sand.u32 1, %s2995_s21  }
 0x6e5   : > { %s2517_s12 = scalar_lea.sflag [#allocation6], %s2516_s11 }
 0x6e6   : > { %p2697_p1 = pnand %p2700_p0, %p3107_p8 }
 0x6e8   : > { %p2698_p2 = pneg %p2697_p1 }
 0x6ea   : > { %2990 = dma.done.wait (%p2698_p2), %s2517_s12, 64  }
 0x6eb   : > { %2992 = vsyncadd (%p2698_p2), %s2517_s12, 4294967232  ;;  %s19_s26 = sadd.s32 1, %s3015_s26   ;;  %s5001_s21 = smov %s2999_s22 }
 0x6ec   : > { %p16_p3 = scmp.ge.s32.totalorder %s19_s26, 4   ;;  %s5002_s22 = smov %s3003_s23 }
 0x6ed   : > { %s5003_s23 = smov %s3113_s10  ;;  %s5004_s24 = smov %s3011_s25 }
 0x6ee   : > { %s5005_s25 = smov %s5007_s29  ;;  %18 = sbr.rel (!%p16_p3) target bundleno = 4 (0x4), region = 87 }
 0x6f3   :  { %2522 = vsyncpa [#allocation6], 1 }
 0x6f4   :  { %2524 = vsyncpa [#allocation6 + $0x1], 1 }

</bundles_post_ra>
